<compile_context>
chip_gen: v5e
topology: v5e:2x2
jax: 0.10.0
libtpu: 0.0.40
codegen_flags: <defaults>
</compile_context>

<pallas_src>
import math

import jax
import jax.numpy as jnp
from jax.experimental import pallas as pl
from jax.experimental.pallas import tpu as pltpu

# Small, module-consistent hyperparameters.
N_LAYERS = 2
N_HEADS = 4
D_MODEL = 32
D_FF = 64
B = 2
L = 8
BL = B * L
HEAD_DIM = D_MODEL // N_HEADS
LN_EPS_BLOCK = 1e-5   # nn.LayerNorm default inside encoder blocks
LN_EPS_LAST = 1e-8    # last_layernorm eps from the module


def _layernorm(x, gamma, beta, eps):
    """PyTorch-style LayerNorm over the last dim of a [R, D] tile."""
    mu = jnp.mean(x, axis=-1, keepdims=True)
    var = jnp.mean((x - mu) ** 2, axis=-1, keepdims=True)
    return (x - mu) * jax.lax.rsqrt(var + eps) * gamma + beta


# ----------------------------------------------------------------------------
# Fused kernel: all encoder blocks + last LayerNorm + pos/neg logits.
# Everything (weights ~70 KB, activations ~2 KB) is VMEM-resident; no grid.
# ----------------------------------------------------------------------------
def fused_forward_kernel(x_ref, pos_ref, neg_ref,
                         wqkv_ref, bqkv_ref, wo_ref, bo_ref, ln1_ref,
                         w1_ref, b1_ref, w2_ref, b2_ref, ln2_ref,
                         lastln_ref,
                         embed_ref, logits_ref):
    scale = 1.0 / math.sqrt(HEAD_DIM)
    h = x_ref[...]                                        # [B*L, D]

    for layer in range(N_LAYERS):                         # static layer loop
        # ---- fused QKV projection for the whole batch: [16,32] x [32,96] ----
        qkv = jnp.dot(h, wqkv_ref[layer],
                      preferred_element_type=jnp.float32) + bqkv_ref[layer]
        q = qkv[:, 0:D_MODEL]
        k = qkv[:, D_MODEL:2 * D_MODEL]
        v = qkv[:, 2 * D_MODEL:3 * D_MODEL]

        # ---- multi-head attention as one (batch*head)-batched contraction ----
        def to_heads(t):
            # [B*L, D] -> [B*H, L, HEAD_DIM] via static slicing + stack.
            return jnp.stack(
                [t[b * L:(b + 1) * L, hh * HEAD_DIM:(hh + 1) * HEAD_DIM]
                 for b in range(B) for hh in range(N_HEADS)], axis=0)

        q3, k3, v3 = to_heads(q), to_heads(k), to_heads(v)          # [B*H, L, hd]
        s = jnp.einsum('bqd,bkd->bqk', q3, k3,
                       preferred_element_type=jnp.float32) * scale  # [B*H, L, L]
        m = jnp.max(s, axis=-1, keepdims=True)
        e = jnp.exp(s - m)
        p = e * pl.reciprocal(jnp.sum(e, axis=-1, keepdims=True), approx=True)
        o3 = jnp.einsum('bqk,bkd->bqd', p, v3,
                        preferred_element_type=jnp.float32)         # [B*H, L, hd]

        # Reassemble heads -> [B*L, D].
        attn = jnp.concatenate(
            [jnp.concatenate([o3[b * N_HEADS + hh] for hh in range(N_HEADS)],
                             axis=-1)
             for b in range(B)], axis=0)

        attn = jnp.dot(attn, wo_ref[layer],
                       preferred_element_type=jnp.float32) + bo_ref[layer]

        ln1 = ln1_ref[layer]                              # [2, D]
        h = _layernorm(h + attn, ln1[0:1, :], ln1[1:2, :], LN_EPS_BLOCK)

        # ---- FFN: [16,32]x[32,64] -> ReLU -> [16,64]x[64,32] ----
        f = jnp.dot(h, w1_ref[layer],
                    preferred_element_type=jnp.float32) + b1_ref[layer]
        f = jnp.maximum(f, 0.0)
        f = jnp.dot(f, w2_ref[layer],
                    preferred_element_type=jnp.float32) + b2_ref[layer]

        ln2 = ln2_ref[layer]
        h = _layernorm(h + f, ln2[0:1, :], ln2[1:2, :], LN_EPS_BLOCK)

    # ---- last LayerNorm (eps=1e-8) + pos/neg logits ----
    y = _layernorm(h, lastln_ref[0:1, :], lastln_ref[1:2, :], LN_EPS_LAST)
    embed_ref[...] = y
    pos_col = jnp.sum(y * pos_ref[...], axis=-1, keepdims=True)   # [B*L, 1]
    neg_col = jnp.sum(y * neg_ref[...], axis=-1, keepdims=True)   # [B*L, 1]
    # Single lane-dense logits slab: row 0 = pos, row 1 = neg.
    logits_ref[...] = jnp.concatenate([pos_col, neg_col], axis=-1).T  # [2, B*L]


# ----------------------------------------------------------------------------
# Wrapper: single pallas_call, everything VMEM-resident (no grid, no tiling —
# total footprint is well under 1 MiB even on v7x's 64 MiB VMEM).
# ----------------------------------------------------------------------------
@jax.jit
def pc_transformer_forward(x_embed, pos_embed, neg_embed, params):
    (wqkv, bqkv, wo, bo, ln1, w1, b1, w2, b2, ln2, lastln) = params
    x2 = x_embed.reshape(BL, D_MODEL)
    p2 = pos_embed.reshape(BL, D_MODEL)
    n2 = neg_embed.reshape(BL, D_MODEL)
    args = (x2, p2, n2, wqkv, bqkv, wo, bo, ln1, w1, b1, w2, b2, ln2, lastln)

    vmem = pl.BlockSpec(memory_space=pltpu.MemorySpace.VMEM)
    embed2, logits = pl.pallas_call(
        fused_forward_kernel,
        out_shape=(jax.ShapeDtypeStruct((BL, D_MODEL), jnp.float32),
                   jax.ShapeDtypeStruct((2, BL), jnp.float32)),
        in_specs=[vmem] * len(args),
        out_specs=(vmem, vmem),
    )(*args)

    embed = embed2.reshape(B, L, D_MODEL)
    pos_logits = logits[0].reshape(B, L)
    neg_logits = logits[1].reshape(B, L)
    return pos_logits, neg_logits, embed


def init_params(key):
    """Deterministic synthetic parameters, stacked along a leading layer axis."""
    def w(k, shape):
        return jax.random.normal(k, shape, jnp.float32) * 0.02

    wqkv, bqkv, wo, bo, ln1, w1, b1, w2, b2, ln2 = ([] for _ in range(10))
    for i in range(N_LAYERS):
        keys = jax.random.split(jax.random.fold_in(key, i), 4)
        wqkv.append(w(keys[0], (D_MODEL, 3 * D_MODEL)))
        bqkv.append(jnp.zeros((1, 3 * D_MODEL), jnp.float32))
        wo.append(w(keys[1], (D_MODEL, D_MODEL)))
        bo.append(jnp.zeros((1, D_MODEL), jnp.float32))
        ln1.append(jnp.stack([jnp.ones(D_MODEL, jnp.float32),
                              jnp.zeros(D_MODEL, jnp.float32)], axis=0))
        w1.append(w(keys[2], (D_MODEL, D_FF)))
        b1.append(jnp.zeros((1, D_FF), jnp.float32))
        w2.append(w(keys[3], (D_FF, D_MODEL)))
        b2.append(jnp.zeros((1, D_MODEL), jnp.float32))
        ln2.append(jnp.stack([jnp.ones(D_MODEL, jnp.float32),
                              jnp.zeros(D_MODEL, jnp.float32)], axis=0))

    stack = lambda xs: jnp.stack(xs, axis=0)
    lastln = jnp.stack([jnp.ones(D_MODEL, jnp.float32),
                        jnp.zeros(D_MODEL, jnp.float32)], axis=0)
    return (stack(wqkv), stack(bqkv), stack(wo), stack(bo), stack(ln1),
            stack(w1), stack(b1), stack(w2), stack(b2), stack(ln2), lastln)


if __name__ == "__main__":
    key = jax.random.PRNGKey(0)
    kx, kp, kn, kparam = jax.random.split(key, 4)
    x_embed = jax.random.normal(kx, (B, L, D_MODEL), jnp.float32)
    pos_embed = jax.random.normal(kp, (B, L, D_MODEL), jnp.float32)
    neg_embed = jax.random.normal(kn, (B, L, D_MODEL), jnp.float32)
    params = init_params(kparam)

    pos_logits, neg_logits, embed = pc_transformer_forward(
        x_embed, pos_embed, neg_embed, params)
    jax.block_until_ready((pos_logits, neg_logits, embed))

    assert pos_logits.shape == (B, L) and neg_logits.shape == (B, L)
    assert embed.shape == (B, L, D_MODEL)
    assert bool(jnp.all(jnp.isfinite(pos_logits))
                & jnp.all(jnp.isfinite(neg_logits))
                & jnp.all(jnp.isfinite(embed)))
    print("KERNEL_OK")
</pallas_src>

<mosaic_0001>
module attributes {stable_mosaic.version = 11 : i64} {
  func.func @fused_forward_kernel(%arg0: memref<16x32xf32, #tpu.memory_space<vmem>>, %arg1: memref<16x32xf32, #tpu.memory_space<vmem>>, %arg2: memref<16x32xf32, #tpu.memory_space<vmem>>, %arg3: memref<2x32x96xf32, #tpu.memory_space<vmem>>, %arg4: memref<2x1x96xf32, #tpu.memory_space<vmem>>, %arg5: memref<2x32x32xf32, #tpu.memory_space<vmem>>, %arg6: memref<2x1x32xf32, #tpu.memory_space<vmem>>, %arg7: memref<2x2x32xf32, #tpu.memory_space<vmem>>, %arg8: memref<2x32x64xf32, #tpu.memory_space<vmem>>, %arg9: memref<2x1x64xf32, #tpu.memory_space<vmem>>, %arg10: memref<2x64x32xf32, #tpu.memory_space<vmem>>, %arg11: memref<2x1x32xf32, #tpu.memory_space<vmem>>, %arg12: memref<2x2x32xf32, #tpu.memory_space<vmem>>, %arg13: memref<2x32xf32, #tpu.memory_space<vmem>>, %arg14: memref<16x32xf32, #tpu.memory_space<vmem>>, %arg15: memref<2x16xf32, #tpu.memory_space<vmem>>) attributes {dimension_semantics = [], scalar_prefetch = 0 : i64, scratch_operands = 0 : i64, tpu.core_type = #tpu.core_type<tc>} {
    %c0 = arith.constant 0 : index
    %c0_0 = arith.constant 0 : index
    %0 = vector.load %arg0[%c0, %c0_0] : memref<16x32xf32, #tpu.memory_space<vmem>>, vector<16x32xf32>
    %c0_1 = arith.constant 0 : index
    %c0_2 = arith.constant 0 : index
    %c0_3 = arith.constant 0 : index
    %1 = vector.load %arg3[%c0_1, %c0_2, %c0_3] : memref<2x32x96xf32, #tpu.memory_space<vmem>>, vector<1x32x96xf32>
    %2 = vector.shape_cast %1 : vector<1x32x96xf32> to vector<32x96xf32>
    %cst = arith.constant dense<0.000000e+00> : vector<16x96xf32>
    %3 = tpu.matmul %0, %2, %cst {dimension_numbers = #tpu.dot_dimension_numbers<[1], [0], [0], [1], [0, 0, 1, 1], [], []>} : vector<16x32xf32>, vector<32x96xf32>, vector<16x96xf32> -> vector<16x96xf32>
    %c0_4 = arith.constant 0 : index
    %c0_5 = arith.constant 0 : index
    %c0_6 = arith.constant 0 : index
    %4 = vector.load %arg4[%c0_4, %c0_5, %c0_6] : memref<2x1x96xf32, #tpu.memory_space<vmem>>, vector<1x1x96xf32>
    %5 = vector.shape_cast %4 : vector<1x1x96xf32> to vector<1x96xf32>
    %6 = vector.broadcast %5 : vector<1x96xf32> to vector<16x96xf32>
    %7 = arith.addf %3, %6 : vector<16x96xf32>
    %8 = vector.extract_strided_slice %7 {offsets = [0, 0], sizes = [16, 32], strides = [1, 1]} : vector<16x96xf32> to vector<16x32xf32>
    %9 = vector.extract_strided_slice %7 {offsets = [0, 32], sizes = [16, 32], strides = [1, 1]} : vector<16x96xf32> to vector<16x32xf32>
    %10 = vector.extract_strided_slice %7 {offsets = [0, 64], sizes = [16, 32], strides = [1, 1]} : vector<16x96xf32> to vector<16x32xf32>
    %11 = vector.extract_strided_slice %8 {offsets = [0, 0], sizes = [8, 8], strides = [1, 1]} : vector<16x32xf32> to vector<8x8xf32>
    %12 = vector.extract_strided_slice %8 {offsets = [0, 8], sizes = [8, 8], strides = [1, 1]} : vector<16x32xf32> to vector<8x8xf32>
    %13 = vector.extract_strided_slice %8 {offsets = [0, 16], sizes = [8, 8], strides = [1, 1]} : vector<16x32xf32> to vector<8x8xf32>
    %14 = vector.extract_strided_slice %8 {offsets = [0, 24], sizes = [8, 8], strides = [1, 1]} : vector<16x32xf32> to vector<8x8xf32>
    %15 = vector.extract_strided_slice %8 {offsets = [8, 0], sizes = [8, 8], strides = [1, 1]} : vector<16x32xf32> to vector<8x8xf32>
    %16 = vector.extract_strided_slice %8 {offsets = [8, 8], sizes = [8, 8], strides = [1, 1]} : vector<16x32xf32> to vector<8x8xf32>
    %17 = vector.extract_strided_slice %8 {offsets = [8, 16], sizes = [8, 8], strides = [1, 1]} : vector<16x32xf32> to vector<8x8xf32>
    %18 = vector.extract_strided_slice %8 {offsets = [8, 24], sizes = [8, 8], strides = [1, 1]} : vector<16x32xf32> to vector<8x8xf32>
    %19 = vector.shape_cast %11 : vector<8x8xf32> to vector<1x8x8xf32>
    %20 = vector.shape_cast %12 : vector<8x8xf32> to vector<1x8x8xf32>
    %21 = vector.shape_cast %13 : vector<8x8xf32> to vector<1x8x8xf32>
    %22 = vector.shape_cast %14 : vector<8x8xf32> to vector<1x8x8xf32>
    %23 = vector.shape_cast %15 : vector<8x8xf32> to vector<1x8x8xf32>
    %24 = vector.shape_cast %16 : vector<8x8xf32> to vector<1x8x8xf32>
    %25 = vector.shape_cast %17 : vector<8x8xf32> to vector<1x8x8xf32>
    %26 = vector.shape_cast %18 : vector<8x8xf32> to vector<1x8x8xf32>
    %27 = tpu.concatenate %19, %20, %21, %22, %23, %24, %25, %26 in 0 : vector<1x8x8xf32>, vector<1x8x8xf32>, vector<1x8x8xf32>, vector<1x8x8xf32>, vector<1x8x8xf32>, vector<1x8x8xf32>, vector<1x8x8xf32>, vector<1x8x8xf32> -> vector<8x8x8xf32>
    %28 = vector.extract_strided_slice %9 {offsets = [0, 0], sizes = [8, 8], strides = [1, 1]} : vector<16x32xf32> to vector<8x8xf32>
    %29 = vector.extract_strided_slice %9 {offsets = [0, 8], sizes = [8, 8], strides = [1, 1]} : vector<16x32xf32> to vector<8x8xf32>
    %30 = vector.extract_strided_slice %9 {offsets = [0, 16], sizes = [8, 8], strides = [1, 1]} : vector<16x32xf32> to vector<8x8xf32>
    %31 = vector.extract_strided_slice %9 {offsets = [0, 24], sizes = [8, 8], strides = [1, 1]} : vector<16x32xf32> to vector<8x8xf32>
    %32 = vector.extract_strided_slice %9 {offsets = [8, 0], sizes = [8, 8], strides = [1, 1]} : vector<16x32xf32> to vector<8x8xf32>
    %33 = vector.extract_strided_slice %9 {offsets = [8, 8], sizes = [8, 8], strides = [1, 1]} : vector<16x32xf32> to vector<8x8xf32>
    %34 = vector.extract_strided_slice %9 {offsets = [8, 16], sizes = [8, 8], strides = [1, 1]} : vector<16x32xf32> to vector<8x8xf32>
    %35 = vector.extract_strided_slice %9 {offsets = [8, 24], sizes = [8, 8], strides = [1, 1]} : vector<16x32xf32> to vector<8x8xf32>
    %36 = vector.shape_cast %28 : vector<8x8xf32> to vector<1x8x8xf32>
    %37 = vector.shape_cast %29 : vector<8x8xf32> to vector<1x8x8xf32>
    %38 = vector.shape_cast %30 : vector<8x8xf32> to vector<1x8x8xf32>
    %39 = vector.shape_cast %31 : vector<8x8xf32> to vector<1x8x8xf32>
    %40 = vector.shape_cast %32 : vector<8x8xf32> to vector<1x8x8xf32>
    %41 = vector.shape_cast %33 : vector<8x8xf32> to vector<1x8x8xf32>
    %42 = vector.shape_cast %34 : vector<8x8xf32> to vector<1x8x8xf32>
    %43 = vector.shape_cast %35 : vector<8x8xf32> to vector<1x8x8xf32>
    %44 = tpu.concatenate %36, %37, %38, %39, %40, %41, %42, %43 in 0 : vector<1x8x8xf32>, vector<1x8x8xf32>, vector<1x8x8xf32>, vector<1x8x8xf32>, vector<1x8x8xf32>, vector<1x8x8xf32>, vector<1x8x8xf32>, vector<1x8x8xf32> -> vector<8x8x8xf32>
    %45 = vector.extract_strided_slice %10 {offsets = [0, 0], sizes = [8, 8], strides = [1, 1]} : vector<16x32xf32> to vector<8x8xf32>
    %46 = vector.extract_strided_slice %10 {offsets = [0, 8], sizes = [8, 8], strides = [1, 1]} : vector<16x32xf32> to vector<8x8xf32>
    %47 = vector.extract_strided_slice %10 {offsets = [0, 16], sizes = [8, 8], strides = [1, 1]} : vector<16x32xf32> to vector<8x8xf32>
    %48 = vector.extract_strided_slice %10 {offsets = [0, 24], sizes = [8, 8], strides = [1, 1]} : vector<16x32xf32> to vector<8x8xf32>
    %49 = vector.extract_strided_slice %10 {offsets = [8, 0], sizes = [8, 8], strides = [1, 1]} : vector<16x32xf32> to vector<8x8xf32>
    %50 = vector.extract_strided_slice %10 {offsets = [8, 8], sizes = [8, 8], strides = [1, 1]} : vector<16x32xf32> to vector<8x8xf32>
    %51 = vector.extract_strided_slice %10 {offsets = [8, 16], sizes = [8, 8], strides = [1, 1]} : vector<16x32xf32> to vector<8x8xf32>
    %52 = vector.extract_strided_slice %10 {offsets = [8, 24], sizes = [8, 8], strides = [1, 1]} : vector<16x32xf32> to vector<8x8xf32>
    %53 = vector.shape_cast %45 : vector<8x8xf32> to vector<1x8x8xf32>
    %54 = vector.shape_cast %46 : vector<8x8xf32> to vector<1x8x8xf32>
    %55 = vector.shape_cast %47 : vector<8x8xf32> to vector<1x8x8xf32>
    %56 = vector.shape_cast %48 : vector<8x8xf32> to vector<1x8x8xf32>
    %57 = vector.shape_cast %49 : vector<8x8xf32> to vector<1x8x8xf32>
    %58 = vector.shape_cast %50 : vector<8x8xf32> to vector<1x8x8xf32>
    %59 = vector.shape_cast %51 : vector<8x8xf32> to vector<1x8x8xf32>
    %60 = vector.shape_cast %52 : vector<8x8xf32> to vector<1x8x8xf32>
    %61 = tpu.concatenate %53, %54, %55, %56, %57, %58, %59, %60 in 0 : vector<1x8x8xf32>, vector<1x8x8xf32>, vector<1x8x8xf32>, vector<1x8x8xf32>, vector<1x8x8xf32>, vector<1x8x8xf32>, vector<1x8x8xf32>, vector<1x8x8xf32> -> vector<8x8x8xf32>
    "tpu.trace_start"() <{level = 10 : i32, message = "bqd,bkd->bqk"}> : () -> ()
    %cst_7 = arith.constant dense<0.000000e+00> : vector<8x8x8xf32>
    %62 = tpu.matmul %27, %44, %cst_7 {dimension_numbers = #tpu.dot_dimension_numbers<[2], [2], [1], [1], [0, 0, 0, 1, 1, 1], [0], [0]>} : vector<8x8x8xf32>, vector<8x8x8xf32>, vector<8x8x8xf32> -> vector<8x8x8xf32>
    "tpu.trace_stop"() : () -> ()
    %cst_8 = arith.constant 0.353553385 : f32
    %63 = vector.broadcast %cst_8 : f32 to vector<8x8x8xf32>
    %64 = arith.mulf %62, %63 : vector<8x8x8xf32>
    %cst_9 = arith.constant dense<0xFF800000> : vector<8x8xf32>
    %65 = vector.multi_reduction <maximumf>, %64, %cst_9 [2] : vector<8x8x8xf32> to vector<8x8xf32>
    %66 = vector.shape_cast %65 : vector<8x8xf32> to vector<8x8x1xf32>
    %67 = vector.broadcast %66 : vector<8x8x1xf32> to vector<8x8x8xf32>
    %68 = arith.subf %64, %67 : vector<8x8x8xf32>
    %69 = math.exp %68 : vector<8x8x8xf32>
    %cst_10 = arith.constant dense<0.000000e+00> : vector<8x8xf32>
    %70 = vector.multi_reduction <add>, %69, %cst_10 [2] : vector<8x8x8xf32> to vector<8x8xf32>
    %71 = vector.shape_cast %70 : vector<8x8xf32> to vector<8x8x1xf32>
    %72 = tpu.reciprocal %71 {approx = true} : vector<8x8x1xf32> -> vector<8x8x1xf32>
    %73 = vector.broadcast %72 : vector<8x8x1xf32> to vector<8x8x8xf32>
    %74 = arith.mulf %69, %73 : vector<8x8x8xf32>
    "tpu.trace_start"() <{level = 10 : i32, message = "bqk,bkd->bqd"}> : () -> ()
    %cst_11 = arith.constant dense<0.000000e+00> : vector<8x8x8xf32>
    %75 = tpu.matmul %74, %61, %cst_11 {dimension_numbers = #tpu.dot_dimension_numbers<[2], [1], [1], [2], [0, 0, 0, 1, 1, 2], [0], [0]>} : vector<8x8x8xf32>, vector<8x8x8xf32>, vector<8x8x8xf32> -> vector<8x8x8xf32>
    "tpu.trace_stop"() : () -> ()
    %76 = vector.extract_strided_slice %75 {offsets = [0, 0, 0], sizes = [1, 8, 8], strides = [1, 1, 1]} : vector<8x8x8xf32> to vector<1x8x8xf32>
    %77 = vector.shape_cast %76 : vector<1x8x8xf32> to vector<8x8xf32>
    %78 = vector.extract_strided_slice %75 {offsets = [1, 0, 0], sizes = [1, 8, 8], strides = [1, 1, 1]} : vector<8x8x8xf32> to vector<1x8x8xf32>
    %79 = vector.shape_cast %78 : vector<1x8x8xf32> to vector<8x8xf32>
    %80 = vector.extract_strided_slice %75 {offsets = [2, 0, 0], sizes = [1, 8, 8], strides = [1, 1, 1]} : vector<8x8x8xf32> to vector<1x8x8xf32>
    %81 = vector.shape_cast %80 : vector<1x8x8xf32> to vector<8x8xf32>
    %82 = vector.extract_strided_slice %75 {offsets = [3, 0, 0], sizes = [1, 8, 8], strides = [1, 1, 1]} : vector<8x8x8xf32> to vector<1x8x8xf32>
    %83 = vector.shape_cast %82 : vector<1x8x8xf32> to vector<8x8xf32>
    %84 = tpu.concatenate %77, %79, %81, %83 in 1 : vector<8x8xf32>, vector<8x8xf32>, vector<8x8xf32>, vector<8x8xf32> -> vector<8x32xf32>
    %85 = vector.extract_strided_slice %75 {offsets = [4, 0, 0], sizes = [1, 8, 8], strides = [1, 1, 1]} : vector<8x8x8xf32> to vector<1x8x8xf32>
    %86 = vector.shape_cast %85 : vector<1x8x8xf32> to vector<8x8xf32>
    %87 = vector.extract_strided_slice %75 {offsets = [5, 0, 0], sizes = [1, 8, 8], strides = [1, 1, 1]} : vector<8x8x8xf32> to vector<1x8x8xf32>
    %88 = vector.shape_cast %87 : vector<1x8x8xf32> to vector<8x8xf32>
    %89 = vector.extract_strided_slice %75 {offsets = [6, 0, 0], sizes = [1, 8, 8], strides = [1, 1, 1]} : vector<8x8x8xf32> to vector<1x8x8xf32>
    %90 = vector.shape_cast %89 : vector<1x8x8xf32> to vector<8x8xf32>
    %91 = vector.extract_strided_slice %75 {offsets = [7, 0, 0], sizes = [1, 8, 8], strides = [1, 1, 1]} : vector<8x8x8xf32> to vector<1x8x8xf32>
    %92 = vector.shape_cast %91 : vector<1x8x8xf32> to vector<8x8xf32>
    %93 = tpu.concatenate %86, %88, %90, %92 in 1 : vector<8x8xf32>, vector<8x8xf32>, vector<8x8xf32>, vector<8x8xf32> -> vector<8x32xf32>
    %94 = tpu.concatenate %84, %93 in 0 : vector<8x32xf32>, vector<8x32xf32> -> vector<16x32xf32>
    %c0_12 = arith.constant 0 : index
    %c0_13 = arith.constant 0 : index
    %c0_14 = arith.constant 0 : index
    %95 = vector.load %arg5[%c0_12, %c0_13, %c0_14] : memref<2x32x32xf32, #tpu.memory_space<vmem>>, vector<1x32x32xf32>
    %96 = vector.shape_cast %95 : vector<1x32x32xf32> to vector<32x32xf32>
    %cst_15 = arith.constant dense<0.000000e+00> : vector<16x32xf32>
    %97 = tpu.matmul %94, %96, %cst_15 {dimension_numbers = #tpu.dot_dimension_numbers<[1], [0], [0], [1], [0, 0, 1, 1], [], []>} : vector<16x32xf32>, vector<32x32xf32>, vector<16x32xf32> -> vector<16x32xf32>
    %c0_16 = arith.constant 0 : index
    %c0_17 = arith.constant 0 : index
    %c0_18 = arith.constant 0 : index
    %98 = vector.load %arg6[%c0_16, %c0_17, %c0_18] : memref<2x1x32xf32, #tpu.memory_space<vmem>>, vector<1x1x32xf32>
    %99 = vector.shape_cast %98 : vector<1x1x32xf32> to vector<1x32xf32>
    %100 = vector.broadcast %99 : vector<1x32xf32> to vector<16x32xf32>
    %101 = arith.addf %97, %100 : vector<16x32xf32>
    %c0_19 = arith.constant 0 : index
    %c0_20 = arith.constant 0 : index
    %c0_21 = arith.constant 0 : index
    %102 = vector.load %arg7[%c0_19, %c0_20, %c0_21] : memref<2x2x32xf32, #tpu.memory_space<vmem>>, vector<1x2x32xf32>
    %103 = vector.shape_cast %102 : vector<1x2x32xf32> to vector<2x32xf32>
    %104 = arith.addf %0, %101 : vector<16x32xf32>
    %105 = vector.extract_strided_slice %103 {offsets = [0, 0], sizes = [1, 32], strides = [1, 1]} : vector<2x32xf32> to vector<1x32xf32>
    %106 = vector.extract_strided_slice %103 {offsets = [1, 0], sizes = [1, 32], strides = [1, 1]} : vector<2x32xf32> to vector<1x32xf32>
    %cst_22 = arith.constant dense<0.000000e+00> : vector<16xf32>
    %107 = vector.multi_reduction <add>, %104, %cst_22 [1] : vector<16x32xf32> to vector<16xf32>
    %108 = vector.shape_cast %107 : vector<16xf32> to vector<16x1xf32>
    %cst_23 = arith.constant 3.200000e+01 : f32
    %109 = vector.broadcast %cst_23 : f32 to vector<16x1xf32>
    %110 = arith.divf %108, %109 : vector<16x1xf32>
    %111 = vector.broadcast %110 : vector<16x1xf32> to vector<16x32xf32>
    %112 = arith.subf %104, %111 : vector<16x32xf32>
    %113 = arith.mulf %112, %112 : vector<16x32xf32>
    %cst_24 = arith.constant dense<0.000000e+00> : vector<16xf32>
    %114 = vector.multi_reduction <add>, %113, %cst_24 [1] : vector<16x32xf32> to vector<16xf32>
    %115 = vector.shape_cast %114 : vector<16xf32> to vector<16x1xf32>
    %cst_25 = arith.constant 3.200000e+01 : f32
    %116 = vector.broadcast %cst_25 : f32 to vector<16x1xf32>
    %117 = arith.divf %115, %116 : vector<16x1xf32>
    %118 = vector.broadcast %110 : vector<16x1xf32> to vector<16x32xf32>
    %119 = arith.subf %104, %118 : vector<16x32xf32>
    %cst_26 = arith.constant 9.99999974E-6 : f32
    %120 = vector.broadcast %cst_26 : f32 to vector<16x1xf32>
    %121 = arith.addf %117, %120 : vector<16x1xf32>
    %122 = math.rsqrt %121 : vector<16x1xf32>
    %123 = vector.broadcast %122 : vector<16x1xf32> to vector<16x32xf32>
    %124 = arith.mulf %119, %123 : vector<16x32xf32>
    %125 = vector.broadcast %105 : vector<1x32xf32> to vector<16x32xf32>
    %126 = arith.mulf %124, %125 : vector<16x32xf32>
    %127 = vector.broadcast %106 : vector<1x32xf32> to vector<16x32xf32>
    %128 = arith.addf %126, %127 : vector<16x32xf32>
    %c0_27 = arith.constant 0 : index
    %c0_28 = arith.constant 0 : index
    %c0_29 = arith.constant 0 : index
    %129 = vector.load %arg8[%c0_27, %c0_28, %c0_29] : memref<2x32x64xf32, #tpu.memory_space<vmem>>, vector<1x32x64xf32>
    %130 = vector.shape_cast %129 : vector<1x32x64xf32> to vector<32x64xf32>
    %cst_30 = arith.constant dense<0.000000e+00> : vector<16x64xf32>
    %131 = tpu.matmul %128, %130, %cst_30 {dimension_numbers = #tpu.dot_dimension_numbers<[1], [0], [0], [1], [0, 0, 1, 1], [], []>} : vector<16x32xf32>, vector<32x64xf32>, vector<16x64xf32> -> vector<16x64xf32>
    %c0_31 = arith.constant 0 : index
    %c0_32 = arith.constant 0 : index
    %c0_33 = arith.constant 0 : index
    %132 = vector.load %arg9[%c0_31, %c0_32, %c0_33] : memref<2x1x64xf32, #tpu.memory_space<vmem>>, vector<1x1x64xf32>
    %133 = vector.shape_cast %132 : vector<1x1x64xf32> to vector<1x64xf32>
    %134 = vector.broadcast %133 : vector<1x64xf32> to vector<16x64xf32>
    %135 = arith.addf %131, %134 : vector<16x64xf32>
    %cst_34 = arith.constant 0.000000e+00 : f32
    %136 = vector.broadcast %cst_34 : f32 to vector<16x64xf32>
    %137 = arith.maximumf %135, %136 : vector<16x64xf32>
    %c0_35 = arith.constant 0 : index
    %c0_36 = arith.constant 0 : index
    %c0_37 = arith.constant 0 : index
    %138 = vector.load %arg10[%c0_35, %c0_36, %c0_37] : memref<2x64x32xf32, #tpu.memory_space<vmem>>, vector<1x64x32xf32>
    %139 = vector.shape_cast %138 : vector<1x64x32xf32> to vector<64x32xf32>
    %cst_38 = arith.constant dense<0.000000e+00> : vector<16x32xf32>
    %140 = tpu.matmul %137, %139, %cst_38 {dimension_numbers = #tpu.dot_dimension_numbers<[1], [0], [0], [1], [0, 0, 1, 1], [], []>} : vector<16x64xf32>, vector<64x32xf32>, vector<16x32xf32> -> vector<16x32xf32>
    %c0_39 = arith.constant 0 : index
    %c0_40 = arith.constant 0 : index
    %c0_41 = arith.constant 0 : index
    %141 = vector.load %arg11[%c0_39, %c0_40, %c0_41] : memref<2x1x32xf32, #tpu.memory_space<vmem>>, vector<1x1x32xf32>
    %142 = vector.shape_cast %141 : vector<1x1x32xf32> to vector<1x32xf32>
    %143 = vector.broadcast %142 : vector<1x32xf32> to vector<16x32xf32>
    %144 = arith.addf %140, %143 : vector<16x32xf32>
    %c0_42 = arith.constant 0 : index
    %c0_43 = arith.constant 0 : index
    %c0_44 = arith.constant 0 : index
    %145 = vector.load %arg12[%c0_42, %c0_43, %c0_44] : memref<2x2x32xf32, #tpu.memory_space<vmem>>, vector<1x2x32xf32>
    %146 = vector.shape_cast %145 : vector<1x2x32xf32> to vector<2x32xf32>
    %147 = arith.addf %128, %144 : vector<16x32xf32>
    %148 = vector.extract_strided_slice %146 {offsets = [0, 0], sizes = [1, 32], strides = [1, 1]} : vector<2x32xf32> to vector<1x32xf32>
    %149 = vector.extract_strided_slice %146 {offsets = [1, 0], sizes = [1, 32], strides = [1, 1]} : vector<2x32xf32> to vector<1x32xf32>
    %cst_45 = arith.constant dense<0.000000e+00> : vector<16xf32>
    %150 = vector.multi_reduction <add>, %147, %cst_45 [1] : vector<16x32xf32> to vector<16xf32>
    %151 = vector.shape_cast %150 : vector<16xf32> to vector<16x1xf32>
    %cst_46 = arith.constant 3.200000e+01 : f32
    %152 = vector.broadcast %cst_46 : f32 to vector<16x1xf32>
    %153 = arith.divf %151, %152 : vector<16x1xf32>
    %154 = vector.broadcast %153 : vector<16x1xf32> to vector<16x32xf32>
    %155 = arith.subf %147, %154 : vector<16x32xf32>
    %156 = arith.mulf %155, %155 : vector<16x32xf32>
    %cst_47 = arith.constant dense<0.000000e+00> : vector<16xf32>
    %157 = vector.multi_reduction <add>, %156, %cst_47 [1] : vector<16x32xf32> to vector<16xf32>
    %158 = vector.shape_cast %157 : vector<16xf32> to vector<16x1xf32>
    %cst_48 = arith.constant 3.200000e+01 : f32
    %159 = vector.broadcast %cst_48 : f32 to vector<16x1xf32>
    %160 = arith.divf %158, %159 : vector<16x1xf32>
    %161 = vector.broadcast %153 : vector<16x1xf32> to vector<16x32xf32>
    %162 = arith.subf %147, %161 : vector<16x32xf32>
    %cst_49 = arith.constant 9.99999974E-6 : f32
    %163 = vector.broadcast %cst_49 : f32 to vector<16x1xf32>
    %164 = arith.addf %160, %163 : vector<16x1xf32>
    %165 = math.rsqrt %164 : vector<16x1xf32>
    %166 = vector.broadcast %165 : vector<16x1xf32> to vector<16x32xf32>
    %167 = arith.mulf %162, %166 : vector<16x32xf32>
    %168 = vector.broadcast %148 : vector<1x32xf32> to vector<16x32xf32>
    %169 = arith.mulf %167, %168 : vector<16x32xf32>
    %170 = vector.broadcast %149 : vector<1x32xf32> to vector<16x32xf32>
    %171 = arith.addf %169, %170 : vector<16x32xf32>
    %c1 = arith.constant 1 : index
    %c0_50 = arith.constant 0 : index
    %c0_51 = arith.constant 0 : index
    %172 = vector.load %arg3[%c1, %c0_50, %c0_51] : memref<2x32x96xf32, #tpu.memory_space<vmem>>, vector<1x32x96xf32>
    %173 = vector.shape_cast %172 : vector<1x32x96xf32> to vector<32x96xf32>
    %cst_52 = arith.constant dense<0.000000e+00> : vector<16x96xf32>
    %174 = tpu.matmul %171, %173, %cst_52 {dimension_numbers = #tpu.dot_dimension_numbers<[1], [0], [0], [1], [0, 0, 1, 1], [], []>} : vector<16x32xf32>, vector<32x96xf32>, vector<16x96xf32> -> vector<16x96xf32>
    %c1_53 = arith.constant 1 : index
    %c0_54 = arith.constant 0 : index
    %c0_55 = arith.constant 0 : index
    %175 = vector.load %arg4[%c1_53, %c0_54, %c0_55] : memref<2x1x96xf32, #tpu.memory_space<vmem>>, vector<1x1x96xf32>
    %176 = vector.shape_cast %175 : vector<1x1x96xf32> to vector<1x96xf32>
    %177 = vector.broadcast %176 : vector<1x96xf32> to vector<16x96xf32>
    %178 = arith.addf %174, %177 : vector<16x96xf32>
    %179 = vector.extract_strided_slice %178 {offsets = [0, 0], sizes = [16, 32], strides = [1, 1]} : vector<16x96xf32> to vector<16x32xf32>
    %180 = vector.extract_strided_slice %178 {offsets = [0, 32], sizes = [16, 32], strides = [1, 1]} : vector<16x96xf32> to vector<16x32xf32>
    %181 = vector.extract_strided_slice %178 {offsets = [0, 64], sizes = [16, 32], strides = [1, 1]} : vector<16x96xf32> to vector<16x32xf32>
    %182 = vector.extract_strided_slice %179 {offsets = [0, 0], sizes = [8, 8], strides = [1, 1]} : vector<16x32xf32> to vector<8x8xf32>
    %183 = vector.extract_strided_slice %179 {offsets = [0, 8], sizes = [8, 8], strides = [1, 1]} : vector<16x32xf32> to vector<8x8xf32>
    %184 = vector.extract_strided_slice %179 {offsets = [0, 16], sizes = [8, 8], strides = [1, 1]} : vector<16x32xf32> to vector<8x8xf32>
    %185 = vector.extract_strided_slice %179 {offsets = [0, 24], sizes = [8, 8], strides = [1, 1]} : vector<16x32xf32> to vector<8x8xf32>
    %186 = vector.extract_strided_slice %179 {offsets = [8, 0], sizes = [8, 8], strides = [1, 1]} : vector<16x32xf32> to vector<8x8xf32>
    %187 = vector.extract_strided_slice %179 {offsets = [8, 8], sizes = [8, 8], strides = [1, 1]} : vector<16x32xf32> to vector<8x8xf32>
    %188 = vector.extract_strided_slice %179 {offsets = [8, 16], sizes = [8, 8], strides = [1, 1]} : vector<16x32xf32> to vector<8x8xf32>
    %189 = vector.extract_strided_slice %179 {offsets = [8, 24], sizes = [8, 8], strides = [1, 1]} : vector<16x32xf32> to vector<8x8xf32>
    %190 = vector.shape_cast %182 : vector<8x8xf32> to vector<1x8x8xf32>
    %191 = vector.shape_cast %183 : vector<8x8xf32> to vector<1x8x8xf32>
    %192 = vector.shape_cast %184 : vector<8x8xf32> to vector<1x8x8xf32>
    %193 = vector.shape_cast %185 : vector<8x8xf32> to vector<1x8x8xf32>
    %194 = vector.shape_cast %186 : vector<8x8xf32> to vector<1x8x8xf32>
    %195 = vector.shape_cast %187 : vector<8x8xf32> to vector<1x8x8xf32>
    %196 = vector.shape_cast %188 : vector<8x8xf32> to vector<1x8x8xf32>
    %197 = vector.shape_cast %189 : vector<8x8xf32> to vector<1x8x8xf32>
    %198 = tpu.concatenate %190, %191, %192, %193, %194, %195, %196, %197 in 0 : vector<1x8x8xf32>, vector<1x8x8xf32>, vector<1x8x8xf32>, vector<1x8x8xf32>, vector<1x8x8xf32>, vector<1x8x8xf32>, vector<1x8x8xf32>, vector<1x8x8xf32> -> vector<8x8x8xf32>
    %199 = vector.extract_strided_slice %180 {offsets = [0, 0], sizes = [8, 8], strides = [1, 1]} : vector<16x32xf32> to vector<8x8xf32>
    %200 = vector.extract_strided_slice %180 {offsets = [0, 8], sizes = [8, 8], strides = [1, 1]} : vector<16x32xf32> to vector<8x8xf32>
    %201 = vector.extract_strided_slice %180 {offsets = [0, 16], sizes = [8, 8], strides = [1, 1]} : vector<16x32xf32> to vector<8x8xf32>
    %202 = vector.extract_strided_slice %180 {offsets = [0, 24], sizes = [8, 8], strides = [1, 1]} : vector<16x32xf32> to vector<8x8xf32>
    %203 = vector.extract_strided_slice %180 {offsets = [8, 0], sizes = [8, 8], strides = [1, 1]} : vector<16x32xf32> to vector<8x8xf32>
    %204 = vector.extract_strided_slice %180 {offsets = [8, 8], sizes = [8, 8], strides = [1, 1]} : vector<16x32xf32> to vector<8x8xf32>
    %205 = vector.extract_strided_slice %180 {offsets = [8, 16], sizes = [8, 8], strides = [1, 1]} : vector<16x32xf32> to vector<8x8xf32>
    %206 = vector.extract_strided_slice %180 {offsets = [8, 24], sizes = [8, 8], strides = [1, 1]} : vector<16x32xf32> to vector<8x8xf32>
    %207 = vector.shape_cast %199 : vector<8x8xf32> to vector<1x8x8xf32>
    %208 = vector.shape_cast %200 : vector<8x8xf32> to vector<1x8x8xf32>
    %209 = vector.shape_cast %201 : vector<8x8xf32> to vector<1x8x8xf32>
    %210 = vector.shape_cast %202 : vector<8x8xf32> to vector<1x8x8xf32>
    %211 = vector.shape_cast %203 : vector<8x8xf32> to vector<1x8x8xf32>
    %212 = vector.shape_cast %204 : vector<8x8xf32> to vector<1x8x8xf32>
    %213 = vector.shape_cast %205 : vector<8x8xf32> to vector<1x8x8xf32>
    %214 = vector.shape_cast %206 : vector<8x8xf32> to vector<1x8x8xf32>
    %215 = tpu.concatenate %207, %208, %209, %210, %211, %212, %213, %214 in 0 : vector<1x8x8xf32>, vector<1x8x8xf32>, vector<1x8x8xf32>, vector<1x8x8xf32>, vector<1x8x8xf32>, vector<1x8x8xf32>, vector<1x8x8xf32>, vector<1x8x8xf32> -> vector<8x8x8xf32>
    %216 = vector.extract_strided_slice %181 {offsets = [0, 0], sizes = [8, 8], strides = [1, 1]} : vector<16x32xf32> to vector<8x8xf32>
    %217 = vector.extract_strided_slice %181 {offsets = [0, 8], sizes = [8, 8], strides = [1, 1]} : vector<16x32xf32> to vector<8x8xf32>
    %218 = vector.extract_strided_slice %181 {offsets = [0, 16], sizes = [8, 8], strides = [1, 1]} : vector<16x32xf32> to vector<8x8xf32>
    %219 = vector.extract_strided_slice %181 {offsets = [0, 24], sizes = [8, 8], strides = [1, 1]} : vector<16x32xf32> to vector<8x8xf32>
    %220 = vector.extract_strided_slice %181 {offsets = [8, 0], sizes = [8, 8], strides = [1, 1]} : vector<16x32xf32> to vector<8x8xf32>
    %221 = vector.extract_strided_slice %181 {offsets = [8, 8], sizes = [8, 8], strides = [1, 1]} : vector<16x32xf32> to vector<8x8xf32>
    %222 = vector.extract_strided_slice %181 {offsets = [8, 16], sizes = [8, 8], strides = [1, 1]} : vector<16x32xf32> to vector<8x8xf32>
    %223 = vector.extract_strided_slice %181 {offsets = [8, 24], sizes = [8, 8], strides = [1, 1]} : vector<16x32xf32> to vector<8x8xf32>
    %224 = vector.shape_cast %216 : vector<8x8xf32> to vector<1x8x8xf32>
    %225 = vector.shape_cast %217 : vector<8x8xf32> to vector<1x8x8xf32>
    %226 = vector.shape_cast %218 : vector<8x8xf32> to vector<1x8x8xf32>
    %227 = vector.shape_cast %219 : vector<8x8xf32> to vector<1x8x8xf32>
    %228 = vector.shape_cast %220 : vector<8x8xf32> to vector<1x8x8xf32>
    %229 = vector.shape_cast %221 : vector<8x8xf32> to vector<1x8x8xf32>
    %230 = vector.shape_cast %222 : vector<8x8xf32> to vector<1x8x8xf32>
    %231 = vector.shape_cast %223 : vector<8x8xf32> to vector<1x8x8xf32>
    %232 = tpu.concatenate %224, %225, %226, %227, %228, %229, %230, %231 in 0 : vector<1x8x8xf32>, vector<1x8x8xf32>, vector<1x8x8xf32>, vector<1x8x8xf32>, vector<1x8x8xf32>, vector<1x8x8xf32>, vector<1x8x8xf32>, vector<1x8x8xf32> -> vector<8x8x8xf32>
    "tpu.trace_start"() <{level = 10 : i32, message = "bqd,bkd->bqk"}> : () -> ()
    %cst_56 = arith.constant dense<0.000000e+00> : vector<8x8x8xf32>
    %233 = tpu.matmul %198, %215, %cst_56 {dimension_numbers = #tpu.dot_dimension_numbers<[2], [2], [1], [1], [0, 0, 0, 1, 1, 1], [0], [0]>} : vector<8x8x8xf32>, vector<8x8x8xf32>, vector<8x8x8xf32> -> vector<8x8x8xf32>
    "tpu.trace_stop"() : () -> ()
    %cst_57 = arith.constant 0.353553385 : f32
    %234 = vector.broadcast %cst_57 : f32 to vector<8x8x8xf32>
    %235 = arith.mulf %233, %234 : vector<8x8x8xf32>
    %cst_58 = arith.constant dense<0xFF800000> : vector<8x8xf32>
    %236 = vector.multi_reduction <maximumf>, %235, %cst_58 [2] : vector<8x8x8xf32> to vector<8x8xf32>
    %237 = vector.shape_cast %236 : vector<8x8xf32> to vector<8x8x1xf32>
    %238 = vector.broadcast %237 : vector<8x8x1xf32> to vector<8x8x8xf32>
    %239 = arith.subf %235, %238 : vector<8x8x8xf32>
    %240 = math.exp %239 : vector<8x8x8xf32>
    %cst_59 = arith.constant dense<0.000000e+00> : vector<8x8xf32>
    %241 = vector.multi_reduction <add>, %240, %cst_59 [2] : vector<8x8x8xf32> to vector<8x8xf32>
    %242 = vector.shape_cast %241 : vector<8x8xf32> to vector<8x8x1xf32>
    %243 = tpu.reciprocal %242 {approx = true} : vector<8x8x1xf32> -> vector<8x8x1xf32>
    %244 = vector.broadcast %243 : vector<8x8x1xf32> to vector<8x8x8xf32>
    %245 = arith.mulf %240, %244 : vector<8x8x8xf32>
    "tpu.trace_start"() <{level = 10 : i32, message = "bqk,bkd->bqd"}> : () -> ()
    %cst_60 = arith.constant dense<0.000000e+00> : vector<8x8x8xf32>
    %246 = tpu.matmul %245, %232, %cst_60 {dimension_numbers = #tpu.dot_dimension_numbers<[2], [1], [1], [2], [0, 0, 0, 1, 1, 2], [0], [0]>} : vector<8x8x8xf32>, vector<8x8x8xf32>, vector<8x8x8xf32> -> vector<8x8x8xf32>
    "tpu.trace_stop"() : () -> ()
    %247 = vector.extract_strided_slice %246 {offsets = [0, 0, 0], sizes = [1, 8, 8], strides = [1, 1, 1]} : vector<8x8x8xf32> to vector<1x8x8xf32>
    %248 = vector.shape_cast %247 : vector<1x8x8xf32> to vector<8x8xf32>
    %249 = vector.extract_strided_slice %246 {offsets = [1, 0, 0], sizes = [1, 8, 8], strides = [1, 1, 1]} : vector<8x8x8xf32> to vector<1x8x8xf32>
    %250 = vector.shape_cast %249 : vector<1x8x8xf32> to vector<8x8xf32>
    %251 = vector.extract_strided_slice %246 {offsets = [2, 0, 0], sizes = [1, 8, 8], strides = [1, 1, 1]} : vector<8x8x8xf32> to vector<1x8x8xf32>
    %252 = vector.shape_cast %251 : vector<1x8x8xf32> to vector<8x8xf32>
    %253 = vector.extract_strided_slice %246 {offsets = [3, 0, 0], sizes = [1, 8, 8], strides = [1, 1, 1]} : vector<8x8x8xf32> to vector<1x8x8xf32>
    %254 = vector.shape_cast %253 : vector<1x8x8xf32> to vector<8x8xf32>
    %255 = tpu.concatenate %248, %250, %252, %254 in 1 : vector<8x8xf32>, vector<8x8xf32>, vector<8x8xf32>, vector<8x8xf32> -> vector<8x32xf32>
    %256 = vector.extract_strided_slice %246 {offsets = [4, 0, 0], sizes = [1, 8, 8], strides = [1, 1, 1]} : vector<8x8x8xf32> to vector<1x8x8xf32>
    %257 = vector.shape_cast %256 : vector<1x8x8xf32> to vector<8x8xf32>
    %258 = vector.extract_strided_slice %246 {offsets = [5, 0, 0], sizes = [1, 8, 8], strides = [1, 1, 1]} : vector<8x8x8xf32> to vector<1x8x8xf32>
    %259 = vector.shape_cast %258 : vector<1x8x8xf32> to vector<8x8xf32>
    %260 = vector.extract_strided_slice %246 {offsets = [6, 0, 0], sizes = [1, 8, 8], strides = [1, 1, 1]} : vector<8x8x8xf32> to vector<1x8x8xf32>
    %261 = vector.shape_cast %260 : vector<1x8x8xf32> to vector<8x8xf32>
    %262 = vector.extract_strided_slice %246 {offsets = [7, 0, 0], sizes = [1, 8, 8], strides = [1, 1, 1]} : vector<8x8x8xf32> to vector<1x8x8xf32>
    %263 = vector.shape_cast %262 : vector<1x8x8xf32> to vector<8x8xf32>
    %264 = tpu.concatenate %257, %259, %261, %263 in 1 : vector<8x8xf32>, vector<8x8xf32>, vector<8x8xf32>, vector<8x8xf32> -> vector<8x32xf32>
    %265 = tpu.concatenate %255, %264 in 0 : vector<8x32xf32>, vector<8x32xf32> -> vector<16x32xf32>
    %c1_61 = arith.constant 1 : index
    %c0_62 = arith.constant 0 : index
    %c0_63 = arith.constant 0 : index
    %266 = vector.load %arg5[%c1_61, %c0_62, %c0_63] : memref<2x32x32xf32, #tpu.memory_space<vmem>>, vector<1x32x32xf32>
    %267 = vector.shape_cast %266 : vector<1x32x32xf32> to vector<32x32xf32>
    %cst_64 = arith.constant dense<0.000000e+00> : vector<16x32xf32>
    %268 = tpu.matmul %265, %267, %cst_64 {dimension_numbers = #tpu.dot_dimension_numbers<[1], [0], [0], [1], [0, 0, 1, 1], [], []>} : vector<16x32xf32>, vector<32x32xf32>, vector<16x32xf32> -> vector<16x32xf32>
    %c1_65 = arith.constant 1 : index
    %c0_66 = arith.constant 0 : index
    %c0_67 = arith.constant 0 : index
    %269 = vector.load %arg6[%c1_65, %c0_66, %c0_67] : memref<2x1x32xf32, #tpu.memory_space<vmem>>, vector<1x1x32xf32>
    %270 = vector.shape_cast %269 : vector<1x1x32xf32> to vector<1x32xf32>
    %271 = vector.broadcast %270 : vector<1x32xf32> to vector<16x32xf32>
    %272 = arith.addf %268, %271 : vector<16x32xf32>
    %c1_68 = arith.constant 1 : index
    %c0_69 = arith.constant 0 : index
    %c0_70 = arith.constant 0 : index
    %273 = vector.load %arg7[%c1_68, %c0_69, %c0_70] : memref<2x2x32xf32, #tpu.memory_space<vmem>>, vector<1x2x32xf32>
    %274 = vector.shape_cast %273 : vector<1x2x32xf32> to vector<2x32xf32>
    %275 = arith.addf %171, %272 : vector<16x32xf32>
    %276 = vector.extract_strided_slice %274 {offsets = [0, 0], sizes = [1, 32], strides = [1, 1]} : vector<2x32xf32> to vector<1x32xf32>
    %277 = vector.extract_strided_slice %274 {offsets = [1, 0], sizes = [1, 32], strides = [1, 1]} : vector<2x32xf32> to vector<1x32xf32>
    %cst_71 = arith.constant dense<0.000000e+00> : vector<16xf32>
    %278 = vector.multi_reduction <add>, %275, %cst_71 [1] : vector<16x32xf32> to vector<16xf32>
    %279 = vector.shape_cast %278 : vector<16xf32> to vector<16x1xf32>
    %cst_72 = arith.constant 3.200000e+01 : f32
    %280 = vector.broadcast %cst_72 : f32 to vector<16x1xf32>
    %281 = arith.divf %279, %280 : vector<16x1xf32>
    %282 = vector.broadcast %281 : vector<16x1xf32> to vector<16x32xf32>
    %283 = arith.subf %275, %282 : vector<16x32xf32>
    %284 = arith.mulf %283, %283 : vector<16x32xf32>
    %cst_73 = arith.constant dense<0.000000e+00> : vector<16xf32>
    %285 = vector.multi_reduction <add>, %284, %cst_73 [1] : vector<16x32xf32> to vector<16xf32>
    %286 = vector.shape_cast %285 : vector<16xf32> to vector<16x1xf32>
    %cst_74 = arith.constant 3.200000e+01 : f32
    %287 = vector.broadcast %cst_74 : f32 to vector<16x1xf32>
    %288 = arith.divf %286, %287 : vector<16x1xf32>
    %289 = vector.broadcast %281 : vector<16x1xf32> to vector<16x32xf32>
    %290 = arith.subf %275, %289 : vector<16x32xf32>
    %cst_75 = arith.constant 9.99999974E-6 : f32
    %291 = vector.broadcast %cst_75 : f32 to vector<16x1xf32>
    %292 = arith.addf %288, %291 : vector<16x1xf32>
    %293 = math.rsqrt %292 : vector<16x1xf32>
    %294 = vector.broadcast %293 : vector<16x1xf32> to vector<16x32xf32>
    %295 = arith.mulf %290, %294 : vector<16x32xf32>
    %296 = vector.broadcast %276 : vector<1x32xf32> to vector<16x32xf32>
    %297 = arith.mulf %295, %296 : vector<16x32xf32>
    %298 = vector.broadcast %277 : vector<1x32xf32> to vector<16x32xf32>
    %299 = arith.addf %297, %298 : vector<16x32xf32>
    %c1_76 = arith.constant 1 : index
    %c0_77 = arith.constant 0 : index
    %c0_78 = arith.constant 0 : index
    %300 = vector.load %arg8[%c1_76, %c0_77, %c0_78] : memref<2x32x64xf32, #tpu.memory_space<vmem>>, vector<1x32x64xf32>
    %301 = vector.shape_cast %300 : vector<1x32x64xf32> to vector<32x64xf32>
    %cst_79 = arith.constant dense<0.000000e+00> : vector<16x64xf32>
    %302 = tpu.matmul %299, %301, %cst_79 {dimension_numbers = #tpu.dot_dimension_numbers<[1], [0], [0], [1], [0, 0, 1, 1], [], []>} : vector<16x32xf32>, vector<32x64xf32>, vector<16x64xf32> -> vector<16x64xf32>
    %c1_80 = arith.constant 1 : index
    %c0_81 = arith.constant 0 : index
    %c0_82 = arith.constant 0 : index
    %303 = vector.load %arg9[%c1_80, %c0_81, %c0_82] : memref<2x1x64xf32, #tpu.memory_space<vmem>>, vector<1x1x64xf32>
    %304 = vector.shape_cast %303 : vector<1x1x64xf32> to vector<1x64xf32>
    %305 = vector.broadcast %304 : vector<1x64xf32> to vector<16x64xf32>
    %306 = arith.addf %302, %305 : vector<16x64xf32>
    %cst_83 = arith.constant 0.000000e+00 : f32
    %307 = vector.broadcast %cst_83 : f32 to vector<16x64xf32>
    %308 = arith.maximumf %306, %307 : vector<16x64xf32>
    %c1_84 = arith.constant 1 : index
    %c0_85 = arith.constant 0 : index
    %c0_86 = arith.constant 0 : index
    %309 = vector.load %arg10[%c1_84, %c0_85, %c0_86] : memref<2x64x32xf32, #tpu.memory_space<vmem>>, vector<1x64x32xf32>
    %310 = vector.shape_cast %309 : vector<1x64x32xf32> to vector<64x32xf32>
    %cst_87 = arith.constant dense<0.000000e+00> : vector<16x32xf32>
    %311 = tpu.matmul %308, %310, %cst_87 {dimension_numbers = #tpu.dot_dimension_numbers<[1], [0], [0], [1], [0, 0, 1, 1], [], []>} : vector<16x64xf32>, vector<64x32xf32>, vector<16x32xf32> -> vector<16x32xf32>
    %c1_88 = arith.constant 1 : index
    %c0_89 = arith.constant 0 : index
    %c0_90 = arith.constant 0 : index
    %312 = vector.load %arg11[%c1_88, %c0_89, %c0_90] : memref<2x1x32xf32, #tpu.memory_space<vmem>>, vector<1x1x32xf32>
    %313 = vector.shape_cast %312 : vector<1x1x32xf32> to vector<1x32xf32>
    %314 = vector.broadcast %313 : vector<1x32xf32> to vector<16x32xf32>
    %315 = arith.addf %311, %314 : vector<16x32xf32>
    %c1_91 = arith.constant 1 : index
    %c0_92 = arith.constant 0 : index
    %c0_93 = arith.constant 0 : index
    %316 = vector.load %arg12[%c1_91, %c0_92, %c0_93] : memref<2x2x32xf32, #tpu.memory_space<vmem>>, vector<1x2x32xf32>
    %317 = vector.shape_cast %316 : vector<1x2x32xf32> to vector<2x32xf32>
    %318 = arith.addf %299, %315 : vector<16x32xf32>
    %319 = vector.extract_strided_slice %317 {offsets = [0, 0], sizes = [1, 32], strides = [1, 1]} : vector<2x32xf32> to vector<1x32xf32>
    %320 = vector.extract_strided_slice %317 {offsets = [1, 0], sizes = [1, 32], strides = [1, 1]} : vector<2x32xf32> to vector<1x32xf32>
    %cst_94 = arith.constant dense<0.000000e+00> : vector<16xf32>
    %321 = vector.multi_reduction <add>, %318, %cst_94 [1] : vector<16x32xf32> to vector<16xf32>
    %322 = vector.shape_cast %321 : vector<16xf32> to vector<16x1xf32>
    %cst_95 = arith.constant 3.200000e+01 : f32
    %323 = vector.broadcast %cst_95 : f32 to vector<16x1xf32>
    %324 = arith.divf %322, %323 : vector<16x1xf32>
    %325 = vector.broadcast %324 : vector<16x1xf32> to vector<16x32xf32>
    %326 = arith.subf %318, %325 : vector<16x32xf32>
    %327 = arith.mulf %326, %326 : vector<16x32xf32>
    %cst_96 = arith.constant dense<0.000000e+00> : vector<16xf32>
    %328 = vector.multi_reduction <add>, %327, %cst_96 [1] : vector<16x32xf32> to vector<16xf32>
    %329 = vector.shape_cast %328 : vector<16xf32> to vector<16x1xf32>
    %cst_97 = arith.constant 3.200000e+01 : f32
    %330 = vector.broadcast %cst_97 : f32 to vector<16x1xf32>
    %331 = arith.divf %329, %330 : vector<16x1xf32>
    %332 = vector.broadcast %324 : vector<16x1xf32> to vector<16x32xf32>
    %333 = arith.subf %318, %332 : vector<16x32xf32>
    %cst_98 = arith.constant 9.99999974E-6 : f32
    %334 = vector.broadcast %cst_98 : f32 to vector<16x1xf32>
    %335 = arith.addf %331, %334 : vector<16x1xf32>
    %336 = math.rsqrt %335 : vector<16x1xf32>
    %337 = vector.broadcast %336 : vector<16x1xf32> to vector<16x32xf32>
    %338 = arith.mulf %333, %337 : vector<16x32xf32>
    %339 = vector.broadcast %319 : vector<1x32xf32> to vector<16x32xf32>
    %340 = arith.mulf %338, %339 : vector<16x32xf32>
    %341 = vector.broadcast %320 : vector<1x32xf32> to vector<16x32xf32>
    %342 = arith.addf %340, %341 : vector<16x32xf32>
    %c0_99 = arith.constant 0 : index
    %c0_100 = arith.constant 0 : index
    %343 = vector.load %arg13[%c0_99, %c0_100] : memref<2x32xf32, #tpu.memory_space<vmem>>, vector<1x32xf32>
    %c1_101 = arith.constant 1 : index
    %c0_102 = arith.constant 0 : index
    %344 = vector.load %arg13[%c1_101, %c0_102] : memref<2x32xf32, #tpu.memory_space<vmem>>, vector<1x32xf32>
    %cst_103 = arith.constant dense<0.000000e+00> : vector<16xf32>
    %345 = vector.multi_reduction <add>, %342, %cst_103 [1] : vector<16x32xf32> to vector<16xf32>
    %346 = vector.shape_cast %345 : vector<16xf32> to vector<16x1xf32>
    %cst_104 = arith.constant 3.200000e+01 : f32
    %347 = vector.broadcast %cst_104 : f32 to vector<16x1xf32>
    %348 = arith.divf %346, %347 : vector<16x1xf32>
    %349 = vector.broadcast %348 : vector<16x1xf32> to vector<16x32xf32>
    %350 = arith.subf %342, %349 : vector<16x32xf32>
    %351 = arith.mulf %350, %350 : vector<16x32xf32>
    %cst_105 = arith.constant dense<0.000000e+00> : vector<16xf32>
    %352 = vector.multi_reduction <add>, %351, %cst_105 [1] : vector<16x32xf32> to vector<16xf32>
    %353 = vector.shape_cast %352 : vector<16xf32> to vector<16x1xf32>
    %cst_106 = arith.constant 3.200000e+01 : f32
    %354 = vector.broadcast %cst_106 : f32 to vector<16x1xf32>
    %355 = arith.divf %353, %354 : vector<16x1xf32>
    %356 = vector.broadcast %348 : vector<16x1xf32> to vector<16x32xf32>
    %357 = arith.subf %342, %356 : vector<16x32xf32>
    %cst_107 = arith.constant 9.99999993E-9 : f32
    %358 = vector.broadcast %cst_107 : f32 to vector<16x1xf32>
    %359 = arith.addf %355, %358 : vector<16x1xf32>
    %360 = math.rsqrt %359 : vector<16x1xf32>
    %361 = vector.broadcast %360 : vector<16x1xf32> to vector<16x32xf32>
    %362 = arith.mulf %357, %361 : vector<16x32xf32>
    %363 = vector.broadcast %343 : vector<1x32xf32> to vector<16x32xf32>
    %364 = arith.mulf %362, %363 : vector<16x32xf32>
    %365 = vector.broadcast %344 : vector<1x32xf32> to vector<16x32xf32>
    %366 = arith.addf %364, %365 : vector<16x32xf32>
    %c0_108 = arith.constant 0 : index
    %c0_109 = arith.constant 0 : index
    %367 = vector.load %arg14[%c0_108, %c0_109] : memref<16x32xf32, #tpu.memory_space<vmem>>, vector<16x32xf32>
    tpu.vector_store %arg14[%c0_108, %c0_109], %366 {strides = array<i32>} : memref<16x32xf32, #tpu.memory_space<vmem>>, vector<16x32xf32>,
    %c0_110 = arith.constant 0 : index
    %c0_111 = arith.constant 0 : index
    %368 = vector.load %arg1[%c0_110, %c0_111] : memref<16x32xf32, #tpu.memory_space<vmem>>, vector<16x32xf32>
    %369 = arith.mulf %366, %368 : vector<16x32xf32>
    %cst_112 = arith.constant dense<0.000000e+00> : vector<16xf32>
    %370 = vector.multi_reduction <add>, %369, %cst_112 [1] : vector<16x32xf32> to vector<16xf32>
    %371 = vector.shape_cast %370 : vector<16xf32> to vector<16x1xf32>
    %c0_113 = arith.constant 0 : index
    %c0_114 = arith.constant 0 : index
    %372 = vector.load %arg2[%c0_113, %c0_114] : memref<16x32xf32, #tpu.memory_space<vmem>>, vector<16x32xf32>
    %373 = arith.mulf %366, %372 : vector<16x32xf32>
    %cst_115 = arith.constant dense<0.000000e+00> : vector<16xf32>
    %374 = vector.multi_reduction <add>, %373, %cst_115 [1] : vector<16x32xf32> to vector<16xf32>
    %375 = vector.shape_cast %374 : vector<16xf32> to vector<16x1xf32>
    %376 = tpu.concatenate %371, %375 in 1 : vector<16x1xf32>, vector<16x1xf32> -> vector<16x2xf32>
    %377 = tpu.transpose %376, [1, 0] : vector<16x2xf32> -> vector<2x16xf32>
    %c0_116 = arith.constant 0 : index
    %c0_117 = arith.constant 0 : index
    %378 = vector.load %arg15[%c0_116, %c0_117] : memref<2x16xf32, #tpu.memory_space<vmem>>, vector<2x16xf32>
    tpu.vector_store %arg15[%c0_116, %c0_117], %377 {strides = array<i32>} : memref<2x16xf32, #tpu.memory_space<vmem>>, vector<2x16xf32>,
    return
  }
}

</mosaic_0001>

<bundles_post_ra>
// kernel: squeeze.3
= control target key start
LH: loop header
LB: loop body
LE: loop exit
PB: predicated region body
PF: predicated region fallthrough
CT: control target
= control target key end

     0   :  { %s80_s0 = inlined_call_operand.vmem [shape: f32[16], index: 0, kind: input, shape index: {}]   ;;  %s81_s1 = inlined_call_operand.hbm [shape: f32[2,8], index: 1, kind: output, shape index: {}]  }
   0x1   :  { %v5_v0 = vld [vmem:[%s80_s0] sm:$0x1] }
   0x2   :  { %2 = vsyncpa [#allocation1], 0  ;;  %6 = vst [vmem:[#allocation3] sm:$0x1] %v5_v0  ;;  %vm8_vm0 = vcmask 64512   ;;  %s62_s0 = smov 120  }
   0x3   :  { %s63_s8 = smov [#allocation0]   ;;  %s27_s1 = sshll.u32 %s81_s1, 4  ;;  %s28_s1 = int_to_ptr.hbm [resolvable:$true] %s27_s1 }
   0x4   :  { %s25_s9 = sshll.u32 %s63_s8, 4  ;;  %s26_s9 = int_to_ptr.vmem [resolvable:$true] %s25_s9 }
   0x9   :  { %v10_v1 = vld [vmem:[#allocation3] sm:$0x1]  }
   0xa   :  { %v7_v2 = vld [vmem:[#allocation3] sm:$0x1]   ;;  %11 = vrot.lane.b32.xlu0 %v10_v1, %s62_s0 }
   0xb   :  { %9 = vst.msk [vmem:[#allocation2] sm:$0x1] %vm8_vm0, %v7_v2  }
  0x7c   :  { %v12_v3 = vpop.permute.xlu0 %11  }
  0x7d   :  { %15 = vst.msk [vmem:[#allocation2 + $0x1] sm:$0x1] %vm8_vm0, %v12_v3  }
  0x84   :  { %v18_v4 = vld [vmem:[#allocation2] sm:$0x3] }
  0x85   :  { %21 = vst [vmem:[#allocation0] sm:$0x3] %v18_v4 }
  0x86   :  { %30 = dma.vmem_to_hbm [thread:$0]  %s26_s9, 32, %s28_s1, [#allocation1]  }
  0x87   :  { %60 = dma.done.wait [#allocation1], 32  }
  0x88   :  { %61 = vsyncadd [#allocation1], 4294967264 }
  0x89   :  { %33 = vsyncpa [#allocation1], 1 }

// kernel: pc_transformer_forward.1
= control target key start
LH: loop header
LB: loop body
LE: loop exit
PB: predicated region body
PF: predicated region fallthrough
CT: control target
= control target key end

     0   :  { %21 = vsyncpa [#allocation3], 0  ;;  %s2971_s0 = inlined_call_operand.hbm [shape: f32[16,32], index: 0, kind: input, shape index: {}]   ;;  %s2972_s1 = inlined_call_operand.hbm [shape: f32[16,32], index: 1, kind: input, shape index: {}]   ;;  %s2973_s2 = inlined_call_operand.hbm [shape: f32[16,32], index: 2, kind: input, shape index: {}]   ;;  %s2974_s3 = inlined_call_operand.vmem [shape: f32[2,32,96], index: 3, kind: input, shape index: {}]   ;;  %s2975_s4 = inlined_call_operand.hbm [shape: f32[2,1,96], index: 4, kind: input, shape index: {}]   ;;  %s2976_s5 = inlined_call_operand.vmem [shape: f32[2,32,32], index: 5, kind: input, shape index: {}]   ;;  %s2977_s6 = inlined_call_operand.hbm [shape: f32[2,1,32], index: 6, kind: input, shape index: {}]   ;;  %s2978_s7 = inlined_call_operand.vmem [shape: f32[2,2,32], index: 7, kind: input, shape index: {}]   ;;  %s2979_s8 = inlined_call_operand.vmem [shape: f32[2,32,64], index: 8, kind: input, shape index: {}]   ;;  %s2980_s9 = inlined_call_operand.vmem [shape: f32[2,1,64], index: 9, kind: input, shape index: {}]   ;;  %s2981_s10 = inlined_call_operand.vmem [shape: f32[2,64,32], index: 10, kind: input, shape index: {}]   ;;  %s2982_s11 = inlined_call_operand.hbm [shape: f32[2,1,32], index: 11, kind: input, shape index: {}]   ;;  %s2983_s12 = inlined_call_operand.vmem [shape: f32[2,2,32], index: 12, kind: input, shape index: {}]   ;;  %s2984_s13 = inlined_call_operand.vmem [shape: f32[2,32], index: 13, kind: input, shape index: {}]   ;;  %s2985_s14 = inlined_call_operand.hbm [shape: f32[16,32], index: 14, kind: output, shape index: {0}]   ;;  %s2986_s15 = inlined_call_operand.vmem [shape: f32[2,16], index: 15, kind: output, shape index: {1}]  }
   0x1   :  { %22 = vsyncpa [#allocation6], 0 }
   0x2   :  { %23 = vsyncpa [#allocation9], 0 }
   0x3   :  { %24 = vsyncpa [#allocation12], 0 }
   0x4   :  { %25 = vsyncpa [#allocation4], 0  ;;  %s43_s20 = sshll.u32 %s2972_s1, 4  ;;  %s2342_s21 = smov [#allocation5]   ;;  %s44_s20 = int_to_ptr.hbm [resolvable:$true] %s43_s20 }
   0x5   :  { %s45_s22 = sshll.u32 %s2342_s21, 4  ;;  %s71_s25 = sshll.u32 %s2975_s4, 4  ;;  %s46_s22 = int_to_ptr.vmem [resolvable:$true] %s45_s22  ;;  %s72_s25 = int_to_ptr.hbm [resolvable:$true] %s71_s25 }
   0x6   :  { %s2343_s26 = smov 128   ;;  %s2344_s27 = smov 8  }
   0x7   :  { %51 = dma.hbm_to_vmem [thread:$0]  %s44_s20, 256, %s46_s22, [#allocation6], %s2343_s26, %s2343_s26, %s2344_s27  }
   0x8   :  { %s2345_s28 = smov [#allocation8]   ;;  %s2346_s30 = smov 16  }
   0x9   :  { %s73_s29 = sshll.u32 %s2345_s28, 4  ;;  %s2347_s1 = smov 1   ;;  %s74_s29 = int_to_ptr.vmem [resolvable:$true] %s73_s29 }
   0xa   :  { %79 = dma.hbm_to_vmem [thread:$0]  %s72_s25, 32, %s74_s29, [#allocation9], %s2346_s30, %s2346_s30, %s2347_s1  }
   0xb   :  { %s30_s18 = sshll.u32 %s2971_s0, 4  ;;  %s2348_s4 = smov [#allocation2]   ;;  %s31_s18 = int_to_ptr.hbm [resolvable:$true] %s30_s18 }
   0xc   :  { %s32_s19 = sshll.u32 %s2348_s4, 4  ;;  %s56_s20 = sshll.u32 %s2973_s2, 4  ;;  %s33_s19 = int_to_ptr.vmem [resolvable:$true] %s32_s19  ;;  %s57_s20 = int_to_ptr.hbm [resolvable:$true] %s56_s20 }
   0xd   :  { %38 = dma.hbm_to_vmem [thread:$0]  %s31_s18, 256, %s33_s19, [#allocation3], %s2343_s26, %s2343_s26, %s2344_s27  }
   0xe   :  { %s2349_s22 = smov [#allocation7]   ;;  %s86_s29 = sshll.u32 %s2977_s6, 4  ;;  %s87_s29 = int_to_ptr.hbm [resolvable:$true] %s86_s29 }
   0xf   :  { %s58_s24 = sshll.u32 %s2349_s22, 4  ;;  %s107_s2 = sshll.u32 %s2982_s11, 4  ;;  %s59_s24 = int_to_ptr.vmem [resolvable:$true] %s58_s24  ;;  %s108_s2 = int_to_ptr.hbm [resolvable:$true] %s107_s2 }
  0x10   :  { %64 = dma.hbm_to_vmem [thread:$0]  %s57_s20, 256, %s59_s24, [#allocation6], %s2343_s26, %s2343_s26, %s2344_s27  }
  0x11   :  { %s2350_s17 = smov [#allocation10]   ;;  %s2351_s18 = smov [#allocation11]  }
  0x12   :  { %s88_s4 = sshll.u32 %s2350_s17, 4  ;;  %s109_s19 = sshll.u32 %s2351_s18, 4  ;;  %s89_s4 = int_to_ptr.vmem [resolvable:$true] %s88_s4  ;;  %s110_s19 = int_to_ptr.vmem [resolvable:$true] %s109_s19 }
  0x13   :  { %94 = dma.hbm_to_vmem [thread:$0]  %s87_s29, 32, %s89_s4, [#allocation9], %s2346_s30, %s2346_s30, %s2347_s1  }
  0x14   :  { %115 = dma.hbm_to_vmem [thread:$0]  %s108_s2, 32, %s110_s19, [#allocation12], %s2346_s30, %s2346_s30, %s2347_s1  }
  0x15   :  { %2332 = dma.done.wait [#allocation3], 256  }
  0x16   :  { %2333 = vsyncadd [#allocation3], 4294967040 }
  0x17   :  { %2334 = dma.done.wait [#allocation6], 512  }
  0x18   :  { %2335 = vsyncadd [#allocation6], 4294966784 }
  0x19   :  { %2336 = dma.done.wait [#allocation9], 64  }
  0x1a   :  { %2337 = vsyncadd [#allocation9], 4294967232 }
  0x1b   :  { %2338 = dma.done.wait [#allocation12], 32  }
  0x1c   :  { %2339 = vsyncadd [#allocation12], 4294967264  ;;  %v149_v0 = vld [vmem:[%s2974_s3 + $0x18] sm:$0xff]  ;;  %v148_v1 = vld [vmem:[%s2974_s3 + $0x10] sm:$0xff]  ;;  %vm154_vm0 = vcmask 261120   ;;  %s2352_s25 = smov 104  }
  0x1d   :  { %173 = vmatpush.msra.mxu0 %v149_v0  ;;  %v147_v2 = vld [vmem:[%s2974_s3 + $0x8] sm:$0xff]  ;;  %v146_v3 = vld [vmem:[%s2974_s3] sm:$0xff]  ;;  %v2068_v6 = vld [vmem:[#allocation8] ss:$0 sm:$0xff]  ;;  %s2353_s28 = smov 120   ;;  %s2354_s29 = smov 112  }
  0x1e   :  { %v2485_v4 = vld [vmem:[#allocation2] sm:$0xff]  ;;  %v2489_v5 = vld [vmem:[#allocation2 + $0x8] sm:$0xff]  ;;  %s2355_s0 = smov 96   ;;  %vm200_vm1 = vcmask 64512   ;;  %s2356_s16 = smov 64   ;;  %vm724_vm2 = vcmask 130048  }
  0x1f   :  { %174 = vmatpush.msra.mxu0 %v148_v1  ;;  %s2357_s2 = smov 24   ;;  %vm726_vm3 = vcmask 195584   ;;  %vm891_vm11 = vcmask 523264   ;;  %s1917_s20 = sshll.u32 %s2985_s14, 4  ;;  %s1918_s20 = int_to_ptr.hbm [resolvable:$true] %s1917_s20 }
  0x21   :  { %175 = vmatpush.msra.mxu0 %v147_v2 }
  0x23   :  { %176 = vmatpush.msra.mxu0 %v146_v3 }
  0x24   :  { %1937 = vmatmul.msk.f32.vlgmr.msra.gmra.mxu0 %vm154_vm0, %v2485_v4 }
  0x2c   :  { %1938 = vmatmul.msk.f32.gmra.mxu0 %vm154_vm0, %v2489_v5 }
  0xa1   :  { %v178_v7 = vpop.f32.mrf.mxu0 }
  0xa2   :  { %v2493_v8 = vadd.f32 %v2068_v6, %v178_v7 }
  0xa4   :  { %189 = vrot.lane.b32.xlu1 %v2493_v8, %s2352_s25  ;;  %185 = vrot.lane.b32.xlu0 %v2493_v8, %s2353_s28 }
  0xa9   :  { %v181_v9 = vpop.f32.mrf.mxu0 }
  0xaa   :  { %v2499_v10 = vadd.f32 %v2068_v6, %v181_v9 }
  0xac   :  { %192 = vrot.lane.b32.xlu2 %v2499_v10, %s2353_s28  ;;  %196 = vrot.lane.b32.xlu1 %v2499_v10, %s2352_s25 }
  0xad   :  { %187 = vrot.lane.b32.xlu0 %v2493_v8, %s2354_s29 }
  0xb4   :  { %194 = vrot.lane.b32.xlu2 %v2499_v10, %s2354_s29  ;;  %198 = vrot.lane.b32.xlu1 %v2493_v8, %s2355_s0 }
  0xbc   :  { %303 = vrot.lane.b32.xlu2 %v2499_v10, %s2355_s0 }
 0x106   :  { %v2513_v11 = vpop.permute.xlu2 %192 }
 0x10e   :  { %v2515_v12 = vpop.permute.xlu2 %194 }
 0x116   :  { %v304_v13 = vpop.permute.xlu2 %303  ;;  %v2517_v14 = vpop.permute.xlu1 %189 }
 0x117   :  { %v2519_v15 = vpop.permute.xlu0 %185  ;;  %1947 = vmatpush.xpose.msk.msra.mxu2 %vm200_vm1, %v304_v13  ;;  %277 = vrot.lane.b32.xlu1 %v2517_v14, %s2355_s0 }
 0x118   :  { %225 = vrot.lane.b32.xlu0 %v2519_v15, %s2355_s0 }
 0x11a   :  { %1948 = vmatmul.msk.f32.vlgmr.msra.gmra.mxu2 %vm200_vm1, %v2499_v10 }
 0x11e   :  { %v197_v16 = vpop.permute.xlu1 %196 }
 0x11f   :  { %v188_v17 = vpop.permute.xlu0 %187  ;;  %355 = vrot.lane.b32.xlu1 %v2515_v12, %s2355_s0  ;;  %381 = vrot.lane.b32.xlu2 %v197_v16, %s2355_s0 }
 0x120   :  { %251 = vrot.lane.b32.xlu0 %v188_v17, %s2355_s0  ;;  %v2048_v49 = vpack.i.bf16 %v197_v16, %v188_v17 }
 0x126   :  { %v199_v18 = vpop.permute.xlu1 %198 }
 0x127   :  { %1939 = vmatpush.xpose.msk.msra.mxu1 %vm200_vm1, %v199_v18 }
 0x128   :  { %329 = vrot.lane.b32.xlu0 %v2513_v11, %s2355_s0 }
 0x12a   :  { %1940 = vmatmul.msk.f32.vlgmr.msra.gmra.mxu1 %vm200_vm1, %v2493_v8 }
 0x179   :  { %v382_v19 = vpop.permute.xlu2 %381 }
 0x17a   :  { %1953 = vmatpush.xpose.msk.msrb.mxu2 %vm200_vm1, %v382_v19 }
 0x17d   :  { %1954 = vmatmul.msk.f32.vlgmr.msrb.gmra.mxu2 %vm200_vm1, %v197_v16 }
 0x189   :  { %v278_v20 = vpop.permute.xlu1 %277 }
 0x18a   :  { %v226_v21 = vpop.permute.xlu0 %225  ;;  %1945 = vmatpush.xpose.msk.msrb.mxu1 %vm200_vm1, %v278_v20 }
 0x18b   :  { %1941 = vmatpush.xpose.msk.msra.mxu3 %vm200_vm1, %v226_v21 }
 0x18d   :  { %1946 = vmatmul.msk.f32.vlgmr.msrb.gmra.mxu1 %vm200_vm1, %v2517_v14 }
 0x18e   :  { %1942 = vmatmul.msk.f32.vlgmr.msra.gmra.mxu3 %vm200_vm1, %v2519_v15 }
 0x191   :  { %v356_v22 = vpop.permute.xlu1 %355 }
 0x192   :  { %v252_v23 = vpop.permute.xlu0 %251  ;;  %1951 = vmatpush.xpose.msk.msra.mxu1 %vm200_vm1, %v356_v22 }
 0x193   :  { %1943 = vmatpush.xpose.msk.msrb.mxu3 %vm200_vm1, %v252_v23 }
 0x195   :  { %1952 = vmatmul.msk.f32.vlgmr.msra.gmra.mxu1 %vm200_vm1, %v2515_v12 }
 0x196   :  { %1944 = vmatmul.msk.f32.vlgmr.msrb.gmra.mxu3 %vm200_vm1, %v188_v17 }
 0x19a   :  { %v330_v24 = vpop.permute.xlu0 %329 }
 0x19b   :  { %1949 = vmatpush.xpose.msk.msra.mxu3 %vm200_vm1, %v330_v24 }
 0x19d   :  { %v326_v29 = vpop.f32.mrf.mxu2 }
 0x19e   :  { %1950 = vmatmul.msk.f32.vlgmr.msra.gmra.mxu3 %vm200_vm1, %v2513_v11  ;;  %v2554_v30 = vmul.f32 0.35355338, %v326_v29 }
 0x1a0   :  { %v427_v35 = vsel %vm200_vm1, %v2554_v30, -inf }
 0x1a7   :  { %v222_v25 = vpop.f32.mrf.mxu1 }
 0x1a8   :  { %v2562_v44 = vmul.f32 0.35355338, %v222_v25 }
 0x1aa   :  { %v415_v47 = vsel %vm200_vm1, %v2562_v44, -inf }
 0x200   :  { %v404_v36 = vpop.f32.mrf.mxu2 }
 0x201   :  { %v414_v38 = vmul.f32 0.35355338, %v404_v36 }
 0x203   :  { %v436_v43 = vsel %vm200_vm1, %v414_v38, -inf }
 0x20a   :  { %v300_v26 = vpop.f32.mrf.mxu1 }
 0x20b   :  { %v410_v27 = vmul.f32 0.35355338, %v300_v26 }
 0x20d   :  { %v424_v28 = vsel %vm200_vm1, %v410_v27, -inf }
 0x20e   :  { %425 = vmax.xlane.f32.xlu2 %v424_v28  ;;  %v2053_v28 = vpack.i.bf16 %v2515_v12, %v2513_v11 }
 0x211   :  { %v248_v31 = vpop.f32.mrf.mxu3 }
 0x212   :  { %v408_v32 = vmul.f32 0.35355338, %v248_v31  ;;  %v378_v34 = vpop.f32.mrf.mxu1 }
 0x213   :  { %v413_v37 = vmul.f32 0.35355338, %v378_v34 }
 0x214   :  { %v418_v33 = vsel %vm200_vm1, %v408_v32, -inf }
 0x215   :  { %419 = vmax.xlane.f32.xlu0 %v418_v33  ;;  %v433_v41 = vsel %vm200_vm1, %v413_v37, -inf }
 0x216   :  { %428 = vmax.xlane.f32.xlu2 %v427_v35 }
 0x219   :  { %v274_v39 = vpop.f32.mrf.mxu3 }
 0x21a   :  { %v409_v40 = vmul.f32 0.35355338, %v274_v39 }
 0x21c   :  { %v421_v42 = vsel %vm200_vm1, %v409_v40, -inf }
 0x21d   :  { %434 = vmax.xlane.f32.xlu0 %v433_v41  ;;  %422 = vmax.xlane.f32.xlu1 %v421_v42 }
 0x21e   :  { %437 = vmax.xlane.f32.xlu2 %v436_v43 }
 0x221   :  { %v352_v45 = vpop.f32.mrf.mxu3 }
 0x222   :  { %v412_v46 = vmul.f32 0.35355338, %v352_v45 }
 0x224   :  { %v430_v48 = vsel %vm200_vm1, %v412_v46, -inf }
 0x225   :  { %416 = vmax.xlane.f32.xlu1 %v415_v47 }
 0x226   :  { %431 = vmax.xlane.f32.xlu2 %v430_v48 }
 0x23e   :  { %2049 = vrot.lane.b32.xlu2 %v2048_v49, %s2356_s16 }
 0x281   :  { %v426_v50 = vpop.xlane.xlu2 %425 }
 0x282   :  { %v442_v51 = vsub.f32 %v410_v27, %v426_v50  ;;  %v2043_v27 = vpack.i.bf16 %v2519_v15, %v2517_v14 }
 0x284   :  { %v453_v52 = vmul.f32 1.442695, %v442_v51 }
 0x286   :  { %2078 = vpow2.f32 %v453_v52 }
 0x288   :  { %v420_v53 = vpop.xlane.xlu0 %419 }
 0x289   :  { %v440_v54 = vsub.f32 %v408_v32, %v420_v53  ;;  %v429_v55 = vpop.xlane.xlu2 %428 }
 0x28a   :  { %v443_v14 = vsub.f32 %v2554_v30, %v429_v55 }
 0x28b   :  { %v449_v56 = vmul.f32 1.442695, %v440_v54 }
 0x28c   :  { %v2568_v57 = vpop.eup %2078  ;;  %v455_v33 = vmul.f32 1.442695, %v443_v14 }
 0x28d   :  { %2080 = vpow2.f32 %v449_v56  ;;  %v472_v58 = vsel %vm200_vm1, %v2568_v57, 0.0 }
 0x28e   :  { %473 = vadd.xlane.f32.xlu0 %v472_v58 }
 0x290   :  { %v423_v59 = vpop.xlane.xlu1 %422  ;;  %v435_v60 = vpop.xlane.xlu0 %434 }
 0x291   :  { %v441_v61 = vsub.f32 %v409_v40, %v423_v59  ;;  %v445_v62 = vsub.f32 %v413_v37, %v435_v60  ;;  %v438_v63 = vpop.xlane.xlu2 %437 }
 0x292   :  { %v446_v3 = vsub.f32 %v414_v38, %v438_v63 }
 0x293   :  { %v2572_v0 = vpop.eup %2080  ;;  %v451_v1 = vmul.f32 1.442695, %v441_v61  ;;  %v459_v2 = vmul.f32 1.442695, %v445_v62 }
 0x294   :  { %v466_v6 = vsel %vm200_vm1, %v2572_v0, 0.0  ;;  %v461_v7 = vmul.f32 1.442695, %v446_v3 }
 0x295   :  { %2082 = vpow2.f32 %v451_v1  ;;  %467 = vadd.xlane.f32.xlu1 %v466_v6 }
 0x296   :  { %2084 = vpow2.f32 %v459_v2 }
 0x297   :  { %2086 = vpow2.f32 %v461_v7 }
 0x298   :  { %v417_v29 = vpop.xlane.xlu1 %416 }
 0x299   :  { %v432_v9 = vpop.xlane.xlu2 %431  ;;  %v439_v31 = vsub.f32 %v2562_v44, %v417_v29 }
 0x29a   :  { %v444_v13 = vsub.f32 %v412_v46, %v432_v9 }
 0x29b   :  { %v2083_v16 = vpop.eup %2082  ;;  %v447_v32 = vmul.f32 1.442695, %v439_v31 }
 0x29c   :  { %v2576_v17 = vpop.eup %2084  ;;  %v457_v18 = vmul.f32 1.442695, %v444_v13  ;;  %v469_v19 = vsel %vm200_vm1, %v2083_v16, 0.0  ;;  %v746_v13 = vld [vmem:[%s2976_s5 + $0x18] sm:$0xff] }
 0x29d   :  { %470 = vadd.xlane.f32.xlu2 %v469_v19  ;;  %v481_v20 = vsel %vm200_vm1, %v2576_v17, 0.0  ;;  %v2087_v22 = vpop.eup %2086 }
 0x29e   :  { %2088 = vpow2.f32 %v457_v18  ;;  %482 = vadd.xlane.f32.xlu0 %v481_v20  ;;  %v484_v25 = vsel %vm200_vm1, %v2087_v22, 0.0  ;;  %v743_v18 = vld [vmem:[%s2976_s5] sm:$0xff] }
 0x29f   :  { %2090 = vpow2.f32 %v447_v32 }
 0x2a0   :  { %2092 = vpow2.f32 %v455_v33 }
 0x2a1   :  { %v2050_v21 = vpop.permute.xlu2 %2049 }
 0x2a2   :  { %v2051_v23 = vunpack.i.l.bf16 %v2050_v21  ;;  %v2052_v48 = vunpack.i.h.bf16 %v2050_v21 }
 0x2a4   :  { %v2581_v24 = vpop.eup %2088  ;;  %576 = vmatpush.msrb.mxu1 %v2051_v23 }
 0x2a5   :  { %v478_v26 = vsel %vm200_vm1, %v2581_v24, 0.0  ;;  %v2091_v15 = vpop.eup %2090 }
 0x2a6   :  { %485 = vadd.xlane.f32.xlu0 %v484_v25  ;;  %479 = vadd.xlane.f32.xlu2 %v478_v26  ;;  %v463_v34 = vsel %vm200_vm1, %v2091_v15, 0.0  ;;  %v2093_v11 = vpop.eup %2092 }
 0x2a7   :  { %v475_v12 = vsel %vm200_vm1, %v2093_v11, 0.0 }
 0x2ae   :  { %2044 = vrot.lane.b32.xlu1 %v2043_v27, %s2356_s16 }
 0x2ba   :  { %2054 = vrot.lane.b32.xlu0 %v2053_v28, %s2356_s16 }
 0x2be   :  { %503 = vrot.lane.b32.xlu2 %v2493_v8, %s2356_s16 }
 0x2c6   :  { %607 = vrot.lane.b32.xlu2 %v2499_v10, %s2356_s16 }
 0x2d8   :  { %464 = vadd.xlane.f32.xlu1 %v463_v34 }
 0x2e4   :  { %476 = vadd.xlane.f32.xlu0 %v475_v12 }
 0x301   :  { %v474_v8 = vpop.xlane.xlu0 %473 }
 0x308   :  { %v468_v37 = vpop.xlane.xlu1 %467 }
 0x310   :  { %v471_v35 = vpop.xlane.xlu2 %470 }
 0x311   :  { %2094 = vrcp.f32 %v471_v35  ;;  %v483_v36 = vpop.xlane.xlu0 %482 }
 0x312   :  { %2096 = vrcp.f32 %v474_v8 }
 0x313   :  { %2098 = vrcp.f32 %v468_v37 }
 0x317   :  { %v2095_v10 = vpop.eup %2094 }
 0x318   :  { %v497_v38 = vmul.f32 %v2095_v10, %v2083_v16  ;;  %v2097_v39 = vpop.eup %2096  ;;  %v745_v16 = vld [vmem:[%s2976_s5 + $0x10] sm:$0xff]  ;;  %v2358_v10 = vmov 32.0  }
 0x319   :  { %v480_v30 = vpop.xlane.xlu2 %479  ;;  %v486_v40 = vpop.xlane.xlu0 %485  ;;  %v498_v46 = vmul.f32 %v2097_v39, %v2568_v57 }
 0x31a   :  { %1957 = vmatmul.msk.f32.vlgmr.msrb.gmra.mxu1 %vm200_vm1, %v497_v38  ;;  %v2099_v41 = vpop.eup %2098  ;;  %2100 = vrcp.f32 %v486_v40 }
 0x31b   :  { %v496_v47 = vmul.f32 %v2099_v41, %v2572_v0  ;;  %2102 = vrcp.f32 %v483_v36 }
 0x31c   :  { %2104 = vrcp.f32 %v480_v30 }
 0x320   :  { %v2045_v42 = vpop.permute.xlu1 %2044  ;;  %v2101_v49 = vpop.eup %2100 }
 0x321   :  { %v2046_v43 = vunpack.i.l.bf16 %v2045_v42  ;;  %v504_v44 = vpop.permute.xlu2 %503  ;;  %v2047_v45 = vunpack.i.h.bf16 %v2045_v42  ;;  %v2103_v51 = vpop.eup %2102  ;;  %v502_v52 = vmul.f32 %v2101_v49, %v2087_v22 }
 0x322   :  { %524 = vmatpush.msrb.mxu3 %v504_v44  ;;  %v2105_v53 = vpop.eup %2104  ;;  %v501_v57 = vmul.f32 %v2103_v51, %v2576_v17  ;;  %v744_v17 = vld [vmem:[%s2976_s5 + $0x8] sm:$0xff]  ;;  %v843_v51 = vld [vmem:[%s2979_s8 + $0x18] sm:$0xff] }
 0x323   :  { %550 = vmatpush.msrb.mxu0 %v2047_v45  ;;  %602 = vmatpush.msra.mxu2 %v2046_v43  ;;  %v500_v58 = vmul.f32 %v2105_v53, %v2581_v24  ;;  %v841_v53 = vld [vmem:[%s2979_s8 + $0x8] sm:$0xff] }
 0x324   :  { %1956 = vmatmul.msk.f32.vlgmr.msrb.gmra.mxu0 %vm200_vm1, %v496_v47  ;;  %1958 = vmatmul.msk.f32.vlgmr.msra.gmra.mxu2 %vm200_vm1, %v498_v46 }
 0x325   :  { %706 = vmatpush.msrb.mxu2 %v2052_v48 }
 0x329   :  { %v608_v50 = vpop.permute.xlu2 %607 }
 0x32a   :  { %628 = vmatpush.msra.mxu3 %v608_v50 }
 0x32c   :  { %v2055_v54 = vpop.permute.xlu0 %2054  ;;  %1962 = vmatmul.msk.f32.vlgmr.msrb.gmra.mxu2 %vm200_vm1, %v502_v52  ;;  %v842_v52 = vld [vmem:[%s2979_s8 + $0x10] sm:$0xff] }
 0x32d   :  { %v2057_v55 = vunpack.i.h.bf16 %v2055_v54  ;;  %v2056_v56 = vunpack.i.l.bf16 %v2055_v54  ;;  %v840_v54 = vld [vmem:[%s2979_s8] sm:$0xff] }
 0x32f   :  { %654 = vmatpush.msra.mxu0 %v2056_v56  ;;  %680 = vmatpush.msra.mxu1 %v2057_v55 }
 0x330   :  { %1960 = vmatmul.msk.f32.vlgmr.msra.gmra.mxu0 %vm200_vm1, %v500_v58  ;;  %1961 = vmatmul.msk.f32.vlgmr.msra.gmra.mxu1 %vm200_vm1, %v501_v57  ;;  %v886_v58 = vld [vmem:[%s2981_s10 + $0x38] sm:$0xff] }
 0x331   :  { %866 = vmatpush.msrb.mxu0 %v843_v51  ;;  %906 = vmatpush.msrb.mxu1 %v886_v58  ;;  %v1969_v58 = vld [vmem:[%s2974_s3 + $0x20] sm:$0xff] }
 0x333   :  { %867 = vmatpush.msrb.mxu0 %v842_v52 }
 0x335   :  { %868 = vmatpush.msrb.mxu0 %v841_v53 }
 0x337   :  { %869 = vmatpush.msrb.mxu0 %v840_v54 }
 0x34b   :  { %v465_v59 = vpop.xlane.xlu1 %464 }
 0x34c   :  { %2106 = vrcp.f32 %v465_v59  ;;  %v885_v59 = vld [vmem:[%s2981_s10 + $0x30] sm:$0xff] }
 0x34d   :  { %907 = vmatpush.msrb.mxu1 %v885_v59 }
 0x352   :  { %v2107_v60 = vpop.eup %2106 }
 0x353   :  { %v495_v61 = vmul.f32 %v2107_v60, %v2091_v15  ;;  %v2069_v15 = vld [vmem:[#allocation10] ss:$0 sm:$0xff]  ;;  %v884_v60 = vld [vmem:[%s2981_s10 + $0x28] sm:$0xff] }
 0x354   :  { %908 = vmatpush.msrb.mxu1 %v884_v60 }
 0x355   :  { %1955 = vmatmul.msk.f32.vlgmr.msrb.gmra.mxu3 %vm200_vm1, %v495_v61 }
 0x356   :  { %769 = vmatpush.msrb.mxu3 %v746_v13 }
 0x357   :  { %v477_v62 = vpop.xlane.xlu0 %476 }
 0x358   :  { %2108 = vrcp.f32 %v477_v62  ;;  %770 = vmatpush.msrb.mxu3 %v745_v16 }
 0x359   :  { %2110 = vrcp.f32 %v2358_v10 }
 0x35a   :  { %771 = vmatpush.msrb.mxu3 %v744_v17 }
 0x35c   :  { %772 = vmatpush.msrb.mxu3 %v743_v18 }
 0x35e   :  { %v2109_v63 = vpop.eup %2108 }
 0x35f   :  { %v499_v0 = vmul.f32 %v2109_v63, %v2093_v11  ;;  %v2111_v38 = vpop.eup %2110  ;;  %v883_v63 = vld [vmem:[%s2981_s10 + $0x20] sm:$0xff] }
 0x360   :  { %v790_v30 = vmul.f32 32.0, %v2111_v38  ;;  %vm794_vm4 = vweird.f32 %v2111_v38  ;;  %909 = vmatpush.msrb.mxu1 %v883_v63 }
 0x361   :  { %1959 = vmatmul.msk.f32.vlgmr.msra.gmra.mxu3 %vm200_vm1, %v499_v0 }
 0x362   :  { %v791_v39 = vsub.f32 1.0, %v790_v30 }
 0x364   :  { %v792_v40 = vmul.f32 %v2111_v38, %v791_v39 }
 0x366   :  { %v793_v41 = vadd.f32 %v2111_v38, %v792_v40 }
 0x368   :  { %v2642_v42 = vsel %vm794_vm4, %v2111_v38, %v793_v41  ;;  %v2071_v38 = vld [vmem:[#allocation11] ss:$0 sm:$0xff] }
 0x397   :  { %v578_v2 = vpop.f32.mrf.mxu1 }
 0x3a1   :  { %v552_v1 = vpop.f32.mrf.mxu0 }
 0x3a2   :  { %712 = vrot.lane.b32.xlu2 %v552_v1, %s2344_s27 }
 0x3a7   :  { %v604_v3 = vpop.f32.mrf.mxu2 }
 0x3a8   :  { %720 = vrot.lane.b32.xlu1 %v604_v3, %s2357_s2 }
 0x3aa   :  { %716 = vrot.lane.b32.xlu2 %v578_v2, %s2346_s30  ;;  %v882_v2 = vld [vmem:[%s2981_s10 + $0x18] sm:$0xff] }
 0x3ab   :  { %910 = vmatpush.msrb.mxu1 %v882_v2 }
 0x3ad   :  { %v682_v6 = vpop.f32.mrf.mxu1  ;;  %v656_v7 = vpop.f32.mrf.mxu0 }
 0x3ae   :  { %733 = vrot.lane.b32.xlu0 %v682_v6, %s2346_s30 }
 0x3af   :  { %v708_v9 = vpop.f32.mrf.mxu2 }
 0x3b2   :  { %729 = vrot.lane.b32.xlu2 %v656_v7, %s2344_s27 }
 0x3ba   :  { %737 = vrot.lane.b32.xlu2 %v708_v9, %s2357_s2  ;;  %v780_v9 = vld [vmem:[%s2978_s7] sm:$0x3] }
 0x3d8   :  { %v526_v21 = vpop.f32.mrf.mxu3 }
 0x3e4   :  { %v630_v27 = vpop.f32.mrf.mxu3 }
 0x3fc   :  { %v713_v19 = vpop.permute.xlu2 %712 }
 0x3fd   :  { %v723_v23 = vsel %vm200_vm1, %v526_v21, %v713_v19  ;;  %v834_v19 = vperm.slane %v780_v9, 0 }
 0x404   :  { %v717_v20 = vpop.permute.xlu2 %716 }
 0x405   :  { %v725_v24 = vsel %vm724_vm2, %v723_v23, %v717_v20  ;;  %v837_v23 = vperm.slane %v780_v9, 1 }
 0x40c   :  { %v730_v22 = vpop.permute.xlu2 %729 }
 0x40d   :  { %v740_v28 = vsel %vm200_vm1, %v630_v27, %v730_v22 }
 0x414   :  { %v738_v32 = vpop.permute.xlu2 %737 }
 0x41a   :  { %v721_v25 = vpop.permute.xlu1 %720 }
 0x41b   :  { %v727_v26 = vsel %vm726_vm3, %v725_v24, %v721_v25 }
 0x41c   :  { %1963 = vmatmul.msk.f32.vlgmr.msrb.gmra.mxu3 %vm154_vm0, %v727_v26 }
 0x420   :  { %v734_v29 = vpop.permute.xlu0 %733 }
 0x421   :  { %v741_v31 = vsel %vm724_vm2, %v740_v28, %v734_v29 }
 0x422   :  { %v742_v14 = vsel %vm726_vm3, %v741_v31, %v738_v32 }
 0x424   :  { %1964 = vmatmul.msk.f32.gmra.mxu3 %vm154_vm0, %v742_v14 }
 0x49f   :  { %v774_v33 = vpop.f32.mrf.mxu3 }
 0x4a0   :  { %v775_v34 = vadd.f32 %v2069_v15, %v774_v33  ;;  %v880_v33 = vld [vmem:[%s2981_s10 + $0x8] sm:$0xff] }
 0x4a2   :  { %v781_v11 = vadd.f32 %v775_v34, %v2485_v4  ;;  %v879_v34 = vld [vmem:[%s2981_s10] sm:$0xff] }
 0x4a4   :  { %v783_v12 = vsel %vm154_vm0, %v781_v11, 0.0 }
 0x4a5   :  { %784 = vadd.xlane.f32.xlu2 %v783_v12 }
 0x4a7   :  { %v777_v8 = vpop.f32.mrf.mxu3 }
 0x4a8   :  { %v778_v35 = vadd.f32 %v2069_v15, %v777_v8  ;;  %v881_v15 = vld [vmem:[%s2981_s10 + $0x10] sm:$0xff] }
 0x4a9   :  { %911 = vmatpush.msrb.mxu1 %v881_v15 }
 0x4aa   :  { %v782_v36 = vadd.f32 %v778_v35, %v2489_v5 }
 0x4ab   :  { %912 = vmatpush.msrb.mxu1 %v880_v33 }
 0x4ac   :  { %v786_v37 = vsel %vm154_vm0, %v782_v36, 0.0 }
 0x4ad   :  { %787 = vadd.xlane.f32.xlu1 %v786_v37  ;;  %913 = vmatpush.msrb.mxu1 %v879_v34 }
 0x518   :  { %v785_v4 = vpop.xlane.xlu2 %784 }
 0x519   :  { %v796_v43 = vmul.f32 %v2642_v42, %v785_v4 }
 0x51b   :  { %v798_v44 = vsub.f32 %v781_v11, %v796_v43  ;;  %v2070_v11 = vld [vmem:[%s2980_s9] ss:$0 sm:$0xff] }
 0x51d   :  { %v800_v45 = vmul.f32 %v798_v44, %v798_v44 }
 0x51f   :  { %v802_v5 = vsel %vm154_vm0, %v800_v45, 0.0 }
 0x520   :  { %v788_v46 = vpop.xlane.xlu1 %787  ;;  %803 = vadd.xlane.f32.xlu0 %v802_v5 }
 0x521   :  { %v797_v47 = vmul.f32 %v2642_v42, %v788_v46 }
 0x523   :  { %v799_v48 = vsub.f32 %v782_v36, %v797_v47 }
 0x525   :  { %v801_v49 = vmul.f32 %v799_v48, %v799_v48 }
 0x527   :  { %v805_v50 = vsel %vm154_vm0, %v801_v49, 0.0 }
 0x528   :  { %806 = vadd.xlane.f32.xlu2 %v805_v50 }
 0x593   :  { %v804_v55 = vpop.xlane.xlu0 %803 }
 0x594   :  { %v808_v56 = vmul.f32 %v804_v55, %v2642_v42  ;;  %v1972_v55 = vld [vmem:[%s2974_s3 + $0x38] sm:$0xff] }
 0x595   :  { %1002 = vmatpush.msra.mxu2 %v1972_v55 }
 0x596   :  { %v810_v57 = vadd.f32 1e-05, %v808_v56  ;;  %v1971_v56 = vld [vmem:[%s2974_s3 + $0x30] sm:$0xff] }
 0x597   :  { %1003 = vmatpush.msra.mxu2 %v1971_v56 }
 0x598   :  { %2112 = vrsqrt.f32 %v810_v57  ;;  %vm818_vm6 = vweird.f32 %v810_v57 }
 0x59b   :  { %v807_v61 = vpop.xlane.xlu2 %806 }
 0x59c   :  { %v809_v62 = vmul.f32 %v807_v61, %v2642_v42 }
 0x59e   :  { %v2113_v0 = vpop.eup %2112  ;;  %v811_v1 = vadd.f32 1e-05, %v809_v62 }
 0x59f   :  { %v813_v3 = vmul.f32 %v2113_v0, %v810_v57  ;;  %vm819_vm5 = vweird.f32 %v2113_v0  ;;  %v1970_v57 = vld [vmem:[%s2974_s3 + $0x28] sm:$0xff] }
 0x5a0   :  { %2114 = vrsqrt.f32 %v811_v1  ;;  %vm820_vm7 = vmor %vm818_vm6, %vm819_vm5  ;;  %vm828_vm9 = vweird.f32 %v811_v1  ;;  %1004 = vmatpush.msra.mxu2 %v1970_v57 }
 0x5a1   :  { %v814_v6 = vmul.f32 %v2113_v0, %v813_v3 }
 0x5a2   :  { %1005 = vmatpush.msra.mxu2 %v1969_v58 }
 0x5a3   :  { %v815_v7 = vmul.f32 0.5, %v814_v6 }
 0x5a5   :  { %v816_v13 = vsub.f32 1.5, %v815_v7  ;;  %v921_v7 = vld [vmem:[%s2983_s12] sm:$0x3] }
 0x5a6   :  { %v2115_v16 = vpop.eup %2114 }
 0x5a7   :  { %v817_v17 = vmul.f32 %v2113_v0, %v816_v13  ;;  %v823_v18 = vmul.f32 %v2115_v16, %v811_v1  ;;  %vm829_vm8 = vweird.f32 %v2115_v16 }
 0x5a8   :  { %vm830_vm10 = vmor %vm828_vm9, %vm829_vm8 }
 0x5a9   :  { %v821_v20 = vsel %vm820_vm7, %v2113_v0, %v817_v17  ;;  %v824_v21 = vmul.f32 %v2115_v16, %v823_v18  ;;  %v968_v18 = vperm.slane %v921_v7, 0 }
 0x5aa   :  { %v832_v22 = vmul.f32 %v821_v20, %v798_v44 }
 0x5ab   :  { %v825_v24 = vmul.f32 0.5, %v824_v21 }
 0x5ac   :  { %v835_v25 = vmul.f32 %v834_v19, %v832_v22  ;;  %v971_v22 = vperm.slane %v921_v7, 1 }
 0x5ad   :  { %v826_v26 = vsub.f32 1.5, %v825_v24 }
 0x5ae   :  { %v838_v27 = vadd.f32 %v837_v23, %v835_v25 }
 0x5af   :  { %v827_v28 = vmul.f32 %v2115_v16, %v826_v26 }
 0x5b0   :  { %1965 = vmatmul.msk.f32.vlgmr.msrb.gmra.mxu0 %vm154_vm0, %v838_v27 }
 0x5b1   :  { %v831_v29 = vsel %vm830_vm10, %v2115_v16, %v827_v28 }
 0x5b2   :  { %v833_v31 = vmul.f32 %v831_v29, %v799_v48 }
 0x5b4   :  { %v836_v32 = vmul.f32 %v834_v19, %v833_v31 }
 0x5b6   :  { %v839_v14 = vadd.f32 %v837_v23, %v836_v32 }
 0x5b8   :  { %1966 = vmatmul.msk.f32.gmra.mxu0 %vm154_vm0, %v839_v14 }
 0x62d   :  { %v871_v12 = vpop.f32.mrf.mxu0 }
 0x62e   :  { %v872_v8 = vadd.f32 %v2070_v11, %v871_v12 }
 0x630   :  { %v877_v35 = vmax.f32 %v872_v8, 0.0 }
 0x632   :  { %1967 = vmatmul.msk.f32.vlgmr.msrb.gmra.mxu1 %vm891_vm11, %v877_v35 }
 0x635   :  { %v874_v36 = vpop.f32.mrf.mxu0 }
 0x636   :  { %v875_v37 = vadd.f32 %v2070_v11, %v874_v36 }
 0x638   :  { %v878_v10 = vmax.f32 %v875_v37, 0.0 }
 0x63a   :  { %1968 = vmatmul.msk.f32.gmra.mxu1 %vm891_vm11, %v878_v10 }
 0x6af   :  { %v915_v30 = vpop.f32.mrf.mxu1 }
 0x6b0   :  { %v916_v39 = vadd.f32 %v2071_v38, %v915_v30 }
 0x6b2   :  { %v922_v40 = vadd.f32 %v916_v39, %v838_v27 }
 0x6b4   :  { %v924_v41 = vsel %vm154_vm0, %v922_v40, 0.0 }
 0x6b5   :  { %925 = vadd.xlane.f32.xlu1 %v924_v41 }
 0x6b7   :  { %v918_v4 = vpop.f32.mrf.mxu1 }
 0x6b8   :  { %v919_v43 = vadd.f32 %v2071_v38, %v918_v4 }
 0x6ba   :  { %v923_v44 = vadd.f32 %v919_v43, %v839_v14  ;;  %v2072_v14 = vld [vmem:[#allocation8 + $0x1] ss:$0 sm:$0xff] }
 0x6bc   :  { %v927_v45 = vsel %vm154_vm0, %v923_v44, 0.0 }
 0x6bd   :  { %928 = vadd.xlane.f32.xlu2 %v927_v45 }
 0x728   :  { %v926_v5 = vpop.xlane.xlu1 %925 }
 0x729   :  { %v930_v46 = vmul.f32 %v926_v5, %v2642_v42 }
 0x72b   :  { %v932_v47 = vsub.f32 %v922_v40, %v930_v46 }
 0x72d   :  { %v934_v48 = vmul.f32 %v932_v47, %v932_v47 }
 0x72f   :  { %v936_v49 = vsel %vm154_vm0, %v934_v48, 0.0 }
 0x730   :  { %937 = vadd.xlane.f32.xlu0 %v936_v49  ;;  %v929_v50 = vpop.xlane.xlu2 %928 }
 0x731   :  { %v931_v51 = vmul.f32 %v929_v50, %v2642_v42 }
 0x733   :  { %v933_v52 = vsub.f32 %v923_v44, %v931_v51 }
 0x735   :  { %v935_v53 = vmul.f32 %v933_v52, %v933_v52 }
 0x737   :  { %v939_v54 = vsel %vm154_vm0, %v935_v53, 0.0 }
 0x738   :  { %940 = vadd.xlane.f32.xlu1 %v939_v54 }
 0x7a3   :  { %v938_v59 = vpop.xlane.xlu0 %937 }
 0x7a4   :  { %v942_v60 = vmul.f32 %v938_v59, %v2642_v42 }
 0x7a6   :  { %v944_v61 = vadd.f32 1e-05, %v942_v60 }
 0x7a8   :  { %2116 = vrsqrt.f32 %v944_v61  ;;  %vm952_vm13 = vweird.f32 %v944_v61 }
 0x7ab   :  { %v941_v62 = vpop.xlane.xlu1 %940 }
 0x7ac   :  { %v943_v63 = vmul.f32 %v941_v62, %v2642_v42 }
 0x7ae   :  { %v2117_v0 = vpop.eup %2116  ;;  %v945_v1 = vadd.f32 1e-05, %v943_v63 }
 0x7af   :  { %v947_v2 = vmul.f32 %v2117_v0, %v944_v61  ;;  %vm953_vm12 = vweird.f32 %v2117_v0 }
 0x7b0   :  { %2118 = vrsqrt.f32 %v945_v1  ;;  %vm954_vm14 = vmor %vm952_vm13, %vm953_vm12  ;;  %vm962_vm4 = vweird.f32 %v945_v1 }
 0x7b1   :  { %v948_v3 = vmul.f32 %v2117_v0, %v947_v2 }
 0x7b3   :  { %v949_v6 = vmul.f32 0.5, %v948_v3 }
 0x7b5   :  { %v950_v9 = vsub.f32 1.5, %v949_v6 }
 0x7b6   :  { %v2119_v13 = vpop.eup %2118 }
 0x7b7   :  { %v951_v16 = vmul.f32 %v2117_v0, %v950_v9  ;;  %v957_v17 = vmul.f32 %v2119_v13, %v945_v1  ;;  %vm963_vm15 = vweird.f32 %v2119_v13 }
 0x7b8   :  { %vm964_vm5 = vmor %vm962_vm4, %vm963_vm15 }
 0x7b9   :  { %v955_v19 = vsel %vm954_vm14, %v2117_v0, %v951_v16  ;;  %v958_v20 = vmul.f32 %v2119_v13, %v957_v17 }
 0x7ba   :  { %v966_v21 = vmul.f32 %v955_v19, %v932_v47 }
 0x7bb   :  { %v959_v23 = vmul.f32 0.5, %v958_v20 }
 0x7bc   :  { %v969_v24 = vmul.f32 %v968_v18, %v966_v21 }
 0x7bd   :  { %v960_v25 = vsub.f32 1.5, %v959_v23 }
 0x7be   :  { %v2719_v26 = vadd.f32 %v971_v22, %v969_v24 }
 0x7bf   :  { %v961_v27 = vmul.f32 %v2119_v13, %v960_v25 }
 0x7c0   :  { %1973 = vmatmul.msk.f32.vlgmr.msra.gmra.mxu2 %vm154_vm0, %v2719_v26 }
 0x7c1   :  { %v965_v28 = vsel %vm964_vm5, %v2119_v13, %v961_v27 }
 0x7c2   :  { %v967_v29 = vmul.f32 %v965_v28, %v933_v52 }
 0x7c4   :  { %v970_v31 = vmul.f32 %v968_v18, %v967_v29 }
 0x7c6   :  { %v2723_v32 = vadd.f32 %v971_v22, %v970_v31 }
 0x7c8   :  { %1974 = vmatmul.msk.f32.gmra.mxu2 %vm154_vm0, %v2723_v32 }
 0x843   :  { %v1007_v15 = vpop.f32.mrf.mxu2 }
 0x844   :  { %v2727_v33 = vadd.f32 %v2072_v14, %v1007_v15 }
 0x846   :  { %1018 = vrot.lane.b32.xlu0 %v2727_v33, %s2352_s25  ;;  %1016 = vrot.lane.b32.xlu2 %v2727_v33, %s2354_s29 }
 0x84b   :  { %v1010_v34 = vpop.f32.mrf.mxu2 }
 0x84c   :  { %v2733_v11 = vadd.f32 %v2072_v14, %v1010_v34 }
 0x84e   :  { %1014 = vrot.lane.b32.xlu2 %v2727_v33, %s2353_s28  ;;  %1025 = vrot.lane.b32.xlu0 %v2733_v11, %s2352_s25 }
 0x84f   :  { %1023 = vrot.lane.b32.xlu1 %v2733_v11, %s2354_s29 }
 0x856   :  { %1027 = vrot.lane.b32.xlu0 %v2727_v33, %s2355_s0 }
 0x857   :  { %1021 = vrot.lane.b32.xlu1 %v2733_v11, %s2353_s28 }
 0x8a0   :  { %v2745_v12 = vpop.permute.xlu2 %1016 }
 0x8a1   :  { %1079 = vrot.lane.b32.xlu2 %v2745_v12, %s2355_s0 }
 0x8a8   :  { %v2753_v35 = vpop.permute.xlu2 %1014 }
 0x8b8   :  { %v2749_v8 = vpop.permute.xlu0 %1018 }
 0x8b9   :  { %1105 = vrot.lane.b32.xlu1 %v2749_v8, %s2355_s0  ;;  %v2058_v6 = vpack.i.bf16 %v2749_v8, %v2745_v12 }
 0x8c0   :  { %v2755_v36 = vpop.permute.xlu0 %1025 }
 0x8c1   :  { %v2757_v37 = vpop.permute.xlu1 %1023  ;;  %1209 = vrot.lane.b32.xlu2 %v2755_v36, %s2355_s0  ;;  %1053 = vrot.lane.b32.xlu1 %v2753_v35, %s2355_s0 }
 0x8c2   :  { %1183 = vrot.lane.b32.xlu0 %v2757_v37, %s2355_s0 }
 0x8c8   :  { %v1028_v10 = vpop.permute.xlu0 %1027 }
 0x8c9   :  { %v2765_v38 = vpop.permute.xlu1 %1021  ;;  %1975 = vmatpush.xpose.msk.msra.mxu3 %vm200_vm1, %v1028_v10  ;;  %1131 = vrot.lane.b32.xlu2 %v2733_v11, %s2355_s0 }
 0x8ca   :  { %1157 = vrot.lane.b32.xlu0 %v2765_v38, %s2355_s0 }
 0x8cc   :  { %1976 = vmatmul.msk.f32.vlgmr.msra.gmra.mxu3 %vm200_vm1, %v2727_v33 }
 0x8fb   :  { %v1080_v30 = vpop.permute.xlu2 %1079 }
 0x8fc   :  { %1979 = vmatpush.xpose.msk.msrb.mxu2 %vm200_vm1, %v1080_v30 }
 0x8ff   :  { %1980 = vmatmul.msk.f32.vlgmr.msrb.gmra.mxu2 %vm200_vm1, %v2745_v12 }
 0x91b   :  { %v1210_v39 = vpop.permute.xlu2 %1209 }
 0x923   :  { %v1132_v4 = vpop.permute.xlu2 %1131 }
 0x92b   :  { %v1106_v40 = vpop.permute.xlu1 %1105 }
 0x92c   :  { %1981 = vmatpush.xpose.msk.msrb.mxu3 %vm200_vm1, %v1106_v40 }
 0x92f   :  { %1982 = vmatmul.msk.f32.vlgmr.msrb.gmra.mxu3 %vm200_vm1, %v2749_v8 }
 0x930   :  { %1989 = vmatpush.xpose.msk.msra.mxu3 %vm200_vm1, %v1210_v39 }
 0x933   :  { %v1054_v41 = vpop.permute.xlu1 %1053 }
 0x934   :  { %v1184_v43 = vpop.permute.xlu0 %1183  ;;  %1977 = vmatpush.xpose.msk.msra.mxu0 %vm200_vm1, %v1054_v41 }
 0x935   :  { %1987 = vmatpush.xpose.msk.msra.mxu2 %vm200_vm1, %v1184_v43 }
 0x937   :  { %1978 = vmatmul.msk.f32.vlgmr.msra.gmra.mxu0 %vm200_vm1, %v2753_v35  ;;  %1990 = vmatmul.msk.f32.vlgmr.msra.gmra.mxu3 %vm200_vm1, %v2755_v36 }
 0x938   :  { %1983 = vmatpush.xpose.msk.msrb.mxu0 %vm200_vm1, %v1132_v4  ;;  %1988 = vmatmul.msk.f32.vlgmr.msra.gmra.mxu2 %vm200_vm1, %v2757_v37 }
 0x93c   :  { %v1158_v44 = vpop.permute.xlu0 %1157 }
 0x93d   :  { %1985 = vmatpush.xpose.msk.msra.mxu1 %vm200_vm1, %v1158_v44 }
 0x93f   :  { %1984 = vmatmul.msk.f32.vlgmr.msrb.gmra.mxu0 %vm200_vm1, %v2733_v11 }
 0x940   :  { %1986 = vmatmul.msk.f32.vlgmr.msra.gmra.mxu1 %vm200_vm1, %v2765_v38 }
 0x94f   :  { %v1050_v45 = vpop.f32.mrf.mxu3 }
 0x950   :  { %v2795_v5 = vmul.f32 0.35355338, %v1050_v45 }
 0x952   :  { %v1243_v46 = vsel %vm200_vm1, %v2795_v5, -inf }
 0x953   :  { %1244 = vmax.xlane.f32.xlu1 %v1243_v46 }
 0x982   :  { %v1102_v47 = vpop.f32.mrf.mxu2 }
 0x983   :  { %v1237_v48 = vmul.f32 0.35355338, %v1102_v47 }
 0x985   :  { %v1249_v49 = vsel %vm200_vm1, %v1237_v48, -inf }
 0x986   :  { %1250 = vmax.xlane.f32.xlu1 %v1249_v49 }
 0x9b2   :  { %v1128_v50 = vpop.f32.mrf.mxu3 }
 0x9b3   :  { %v1238_v51 = vmul.f32 0.35355338, %v1128_v50  ;;  %v2063_v50 = vpack.i.bf16 %v2757_v37, %v2753_v35 }
 0x9b4   :  { %v1076_v52 = vpop.f32.mrf.mxu0 }
 0x9b5   :  { %v1236_v53 = vmul.f32 0.35355338, %v1076_v52  ;;  %v1252_v54 = vsel %vm200_vm1, %v1238_v51, -inf }
 0x9b6   :  { %1253 = vmax.xlane.f32.xlu0 %v1252_v54 }
 0x9b7   :  { %v1246_v55 = vsel %vm200_vm1, %v1236_v53, -inf }
 0x9b8   :  { %1247 = vmax.xlane.f32.xlu2 %v1246_v55 }
 0x9ba   :  { %v1232_v0 = vpop.f32.mrf.mxu3 }
 0x9bb   :  { %v1206_v56 = vpop.f32.mrf.mxu2  ;;  %v1242_v2 = vmul.f32 0.35355338, %v1232_v0 }
 0x9bc   :  { %v1241_v57 = vmul.f32 0.35355338, %v1206_v56  ;;  %v1154_v58 = vpop.f32.mrf.mxu0 }
 0x9bd   :  { %v2802_v59 = vmul.f32 0.35355338, %v1154_v58  ;;  %v1180_v60 = vpop.f32.mrf.mxu1  ;;  %v1264_v3 = vsel %vm200_vm1, %v1242_v2, -inf }
 0x9be   :  { %v1240_v61 = vmul.f32 0.35355338, %v1180_v60  ;;  %v1261_v62 = vsel %vm200_vm1, %v1241_v57, -inf }
 0x9bf   :  { %1262 = vmax.xlane.f32.xlu1 %v1261_v62  ;;  %v1255_v63 = vsel %vm200_vm1, %v2802_v59, -inf }
 0x9c0   :  { %v1258_v1 = vsel %vm200_vm1, %v1240_v61, -inf  ;;  %1256 = vmax.xlane.f32.xlu2 %v1255_v63 }
 0x9c1   :  { %1259 = vmax.xlane.f32.xlu0 %v1258_v1 }
 0x9c6   :  { %v1245_v7 = vpop.xlane.xlu1 %1244 }
 0x9c8   :  { %1265 = vmax.xlane.f32.xlu2 %v1264_v3 }
 0x9e0   :  { %2059 = vrot.lane.b32.xlu2 %v2058_v6, %s2356_s16 }
 0x9f9   :  { %v1251_v9 = vpop.xlane.xlu1 %1250 }
 0x9fa   :  { %v1269_v13 = vsub.f32 %v1237_v48, %v1251_v9 }
 0x9fc   :  { %v1279_v16 = vmul.f32 1.442695, %v1269_v13 }
 0x9fe   :  { %2120 = vpow2.f32 %v1279_v16 }
 0xa04   :  { %v2121_v17 = vpop.eup %2120 }
 0xa05   :  { %v1297_v18 = vsel %vm200_vm1, %v2121_v17, 0.0 }
 0xa06   :  { %1298 = vadd.xlane.f32.xlu0 %v1297_v18 }
 0xa29   :  { %v1254_v19 = vpop.xlane.xlu0 %1253 }
 0xa2a   :  { %v1270_v20 = vsub.f32 %v1238_v51, %v1254_v19 }
 0xa2b   :  { %v1248_v21 = vpop.xlane.xlu2 %1247 }
 0xa2c   :  { %v1281_v22 = vmul.f32 1.442695, %v1270_v20  ;;  %v1268_v23 = vsub.f32 %v1236_v53, %v1248_v21 }
 0xa2e   :  { %2122 = vpow2.f32 %v1281_v22  ;;  %v1277_v24 = vmul.f32 1.442695, %v1268_v23 }
 0xa30   :  { %2124 = vpow2.f32 %v1277_v24 }
 0xa32   :  { %v1263_v28 = vpop.xlane.xlu1 %1262 }
 0xa33   :  { %v1257_v25 = vpop.xlane.xlu2 %1256  ;;  %v1273_v34 = vsub.f32 %v1241_v57, %v1263_v28 }
 0xa34   :  { %v2123_v27 = vpop.eup %2122  ;;  %v1260_v29 = vpop.xlane.xlu0 %1259  ;;  %v1271_v51 = vsub.f32 %v2802_v59, %v1257_v25 }
 0xa35   :  { %v1272_v31 = vsub.f32 %v1240_v61, %v1260_v29  ;;  %v1300_v14 = vsel %vm200_vm1, %v2123_v27, 0.0  ;;  %v1287_v10 = vmul.f32 1.442695, %v1273_v34 }
 0xa36   :  { %v2814_v15 = vpop.eup %2124  ;;  %1301 = vadd.xlane.f32.xlu1 %v1300_v14  ;;  %v1283_v52 = vmul.f32 1.442695, %v1271_v51 }
 0xa37   :  { %v1285_v12 = vmul.f32 1.442695, %v1272_v31  ;;  %v1294_v8 = vsel %vm200_vm1, %v2814_v15, 0.0 }
 0xa38   :  { %1295 = vadd.xlane.f32.xlu2 %v1294_v8  ;;  %v2001_v8 = vld [vmem:[%s2976_s5 + $0x30] sm:$0xff] }
 0xa39   :  { %2126 = vpow2.f32 %v1285_v12  ;;  %v2002_v12 = vld [vmem:[%s2976_s5 + $0x38] sm:$0xff] }
 0xa3a   :  { %2128 = vpow2.f32 %v1287_v10  ;;  %v2000_v10 = vld [vmem:[%s2976_s5 + $0x28] sm:$0xff] }
 0xa3b   :  { %v1266_v30 = vpop.xlane.xlu2 %1265 }
 0xa3c   :  { %v1274_v39 = vsub.f32 %v1242_v2, %v1266_v30  ;;  %v1999_v30 = vld [vmem:[%s2976_s5 + $0x20] sm:$0xff] }
 0xa3e   :  { %v1289_v40 = vmul.f32 1.442695, %v1274_v39 }
 0xa3f   :  { %v2818_v41 = vpop.eup %2126 }
 0xa40   :  { %2130 = vpow2.f32 %v1289_v40  ;;  %v1306_v4 = vsel %vm200_vm1, %v2818_v41, 0.0  ;;  %v2129_v46 = vpop.eup %2128 }
 0xa41   :  { %1307 = vadd.xlane.f32.xlu0 %v1306_v4  ;;  %v1309_v49 = vsel %vm200_vm1, %v2129_v46, 0.0  ;;  %2132 = vpow2.f32 %v1283_v52 }
 0xa43   :  { %v2060_v43 = vpop.permute.xlu2 %2059 }
 0xa44   :  { %v2062_v44 = vunpack.i.h.bf16 %v2060_v43  ;;  %v2061_v45 = vunpack.i.l.bf16 %v2060_v43 }
 0xa46   :  { %v2131_v47 = vpop.eup %2130  ;;  %1404 = vmatpush.msrb.mxu2 %v2061_v45  ;;  %1430 = vmatpush.msrb.mxu3 %v2062_v44 }
 0xa47   :  { %v1312_v48 = vsel %vm200_vm1, %v2131_v47, 0.0  ;;  %v2133_v53 = vpop.eup %2132 }
 0xa48   :  { %1313 = vadd.xlane.f32.xlu1 %v1312_v48 }
 0xa49   :  { %1310 = vadd.xlane.f32.xlu0 %v1309_v49 }
 0xa50   :  { %1461 = vrot.lane.b32.xlu2 %v2765_v38, %s2356_s16  ;;  %v1267_v38 = vsub.f32 %v2795_v5, %v1245_v7 }
 0xa52   :  { %v1275_v54 = vmul.f32 1.442695, %v1267_v38 }
 0xa5d   :  { %1513 = vrot.lane.b32.xlu0 %v2755_v36, %s2356_s16  ;;  %v1303_v36 = vsel %vm200_vm1, %v2133_v53, 0.0 }
 0xa61   :  { %2064 = vrot.lane.b32.xlu1 %v2063_v50, %s2356_s16 }
 0xa69   :  { %1331 = vrot.lane.b32.xlu1 %v2727_v33, %s2356_s16 }
 0xa71   :  { %1435 = vrot.lane.b32.xlu1 %v2733_v11, %s2356_s16 }
 0xa79   :  { %v1299_v55 = vpop.xlane.xlu0 %1298  ;;  %1304 = vadd.xlane.f32.xlu2 %v1303_v36 }
 0xa7a   :  { %2134 = vrcp.f32 %v1299_v55 }
 0xa7b   :  { %2136 = vpow2.f32 %v1275_v54 }
 0xa80   :  { %v2135_v35 = vpop.eup %2134 }
 0xa81   :  { %v1325_v37 = vmul.f32 %v2135_v35, %v2121_v17  ;;  %v2137_v56 = vpop.eup %2136 }
 0xa82   :  { %v1291_v33 = vsel %vm200_vm1, %v2137_v56, 0.0 }
 0xa83   :  { %1993 = vmatmul.msk.f32.vlgmr.msrb.gmra.mxu2 %vm200_vm1, %v1325_v37 }
 0xa87   :  { %1292 = vadd.xlane.f32.xlu0 %v1291_v33 }
 0xaa9   :  { %v1302_v57 = vpop.xlane.xlu1 %1301 }
 0xaaa   :  { %2138 = vrcp.f32 %v1302_v57 }
 0xaab   :  { %v1296_v61 = vpop.xlane.xlu2 %1295 }
 0xab0   :  { %v2139_v11 = vpop.eup %2138 }
 0xab1   :  { %v1326_v58 = vmul.f32 %v2139_v11, %v2123_v27 }
 0xab3   :  { %1994 = vmatmul.msk.f32.vlgmr.msrb.gmra.mxu3 %vm200_vm1, %v1326_v58  ;;  %v1462_v16 = vpop.permute.xlu2 %1461 }
 0xab4   :  { %v1308_v5 = vpop.xlane.xlu0 %1307 }
 0xabb   :  { %v1314_v59 = vpop.xlane.xlu1 %1313 }
 0xabc   :  { %2140 = vrcp.f32 %v1314_v59  ;;  %v1311_v60 = vpop.xlane.xlu0 %1310 }
 0xabd   :  { %2142 = vrcp.f32 %v1296_v61 }
 0xabe   :  { %2144 = vrcp.f32 %v1311_v60 }
 0xabf   :  { %2146 = vrcp.f32 %v1308_v5 }
 0xac2   :  { %v2141_v62 = vpop.eup %2140 }
 0xac3   :  { %v1330_v63 = vmul.f32 %v2141_v62, %v2131_v47  ;;  %v2143_v1 = vpop.eup %2142 }
 0xac4   :  { %v2145_v2 = vpop.eup %2144  ;;  %v1324_v9 = vmul.f32 %v2143_v1, %v2814_v15  ;;  %v2007_v1 = vld [vmem:[%s2979_s8 + $0x28] sm:$0xff] }
 0xac5   :  { %v1329_v13 = vmul.f32 %v2145_v2, %v2129_v46  ;;  %v2147_v17 = vpop.eup %2146  ;;  %v2006_v2 = vld [vmem:[%s2979_s8 + $0x20] sm:$0xff] }
 0xac6   :  { %v1328_v19 = vmul.f32 %v2147_v17, %v2818_v41 }
 0xacf   :  { %v1514_v0 = vpop.permute.xlu0 %1513 }
 0xad0   :  { %1534 = vmatpush.msra.mxu3 %v1514_v0  ;;  %v2008_v0 = vld [vmem:[%s2979_s8 + $0x30] sm:$0xff] }
 0xad1   :  { %1998 = vmatmul.msk.f32.vlgmr.msra.gmra.mxu3 %vm200_vm1, %v1330_v63 }
 0xad3   :  { %v2065_v3 = vpop.permute.xlu1 %2064 }
 0xad4   :  { %v2067_v6 = vunpack.i.h.bf16 %v2065_v3  ;;  %v2066_v7 = vunpack.i.l.bf16 %v2065_v3 }
 0xad6   :  { %1378 = vmatpush.msrb.mxu1 %v2066_v7  ;;  %1508 = vmatpush.msra.mxu2 %v2067_v6 }
 0xad7   :  { %1992 = vmatmul.msk.f32.vlgmr.msrb.gmra.mxu1 %vm200_vm1, %v1324_v9  ;;  %1997 = vmatmul.msk.f32.vlgmr.msra.gmra.mxu2 %vm200_vm1, %v1329_v13  ;;  %v2020_v9 = vld [vmem:[%s2981_s10 + $0x78] sm:$0xff]  ;;  %v2019_v13 = vld [vmem:[%s2981_s10 + $0x70] sm:$0xff] }
 0xad8   :  { %1482 = vmatpush.msra.mxu1 %v1462_v16  ;;  %1731 = vmatpush.msrb.mxu2 %v2020_v9  ;;  %v2018_v16 = vld [vmem:[%s2981_s10 + $0x68] sm:$0xff] }
 0xada   :  { %1732 = vmatpush.msrb.mxu2 %v2019_v13 }
 0xadb   :  { %v1332_v18 = vpop.permute.xlu1 %1331 }
 0xadc   :  { %1352 = vmatpush.msra.mxu0 %v1332_v18  ;;  %1733 = vmatpush.msrb.mxu2 %v2018_v16 }
 0xadf   :  { %1996 = vmatmul.msk.f32.vlgmr.msra.gmra.mxu1 %vm200_vm1, %v1328_v19  ;;  %v2017_v19 = vld [vmem:[%s2981_s10 + $0x60] sm:$0xff] }
 0xae0   :  { %1734 = vmatpush.msrb.mxu2 %v2017_v19 }
 0xae3   :  { %v1436_v20 = vpop.permute.xlu1 %1435 }
 0xae4   :  { %1456 = vmatpush.msrb.mxu0 %v1436_v20 }
 0xaec   :  { %v1305_v22 = vpop.xlane.xlu2 %1304 }
 0xafa   :  { %v1293_v21 = vpop.xlane.xlu0 %1292 }
 0xafb   :  { %2148 = vrcp.f32 %v1293_v21 }
 0xafc   :  { %2150 = vrcp.f32 %v1305_v22 }
 0xb01   :  { %v2149_v23 = vpop.eup %2148 }
 0xb02   :  { %v1323_v24 = vmul.f32 %v2149_v23, %v2137_v56  ;;  %v2151_v25 = vpop.eup %2150  ;;  %v2016_v23 = vld [vmem:[%s2981_s10 + $0x58] sm:$0xff] }
 0xb03   :  { %v1327_v27 = vmul.f32 %v2151_v25, %v2133_v53  ;;  %v2073_v53 = vld [vmem:[#allocation10 + $0x1] ss:$0 sm:$0xff]  ;;  %1735 = vmatpush.msrb.mxu2 %v2016_v23 }
 0xb04   :  { %1991 = vmatmul.msk.f32.vlgmr.msra.gmra.mxu0 %vm200_vm1, %v1323_v24 }
 0xb05   :  { %1597 = vmatpush.msra.mxu0 %v2002_v12 }
 0xb06   :  { %v1406_v14 = vpop.f32.mrf.mxu2 }
 0xb07   :  { %1598 = vmatpush.msra.mxu0 %v2001_v8 }
 0xb09   :  { %1599 = vmatpush.msra.mxu0 %v2000_v10 }
 0xb0b   :  { %1600 = vmatpush.msra.mxu0 %v1999_v30 }
 0xb0c   :  { %1995 = vmatmul.msk.f32.vlgmr.msrb.gmra.mxu0 %vm200_vm1, %v1327_v27  ;;  %v2005_v27 = vld [vmem:[%s2978_s7 + $0x2] sm:$0x3] }
 0xb0d   :  { %v1659_v10 = vperm.slane %v2005_v27, 1 }
 0xb36   :  { %v1432_v28 = vpop.f32.mrf.mxu3 }
 0xb54   :  { %v1536_v29 = vpop.f32.mrf.mxu3  ;;  %v1380_v31 = vpop.f32.mrf.mxu1 }
 0xb55   :  { %1563 = vrot.lane.b32.xlu2 %v1536_v29, %s2357_s2  ;;  %1540 = vrot.lane.b32.xlu1 %v1380_v31, %s2344_s27 }
 0xb5a   :  { %v1510_v34 = vpop.f32.mrf.mxu2 }
 0xb5c   :  { %v1484_v15 = vpop.f32.mrf.mxu1 }
 0xb5d   :  { %1555 = vrot.lane.b32.xlu0 %v1484_v15, %s2344_s27  ;;  %1544 = vrot.lane.b32.xlu1 %v1406_v14, %s2346_s30  ;;  %v1656_v14 = vperm.slane %v2005_v27, 0 }
 0xb65   :  { %1548 = vrot.lane.b32.xlu1 %v1432_v28, %s2357_s2 }
 0xb6d   :  { %1559 = vrot.lane.b32.xlu1 %v1510_v34, %s2346_s30 }
 0xb81   :  { %v1354_v41 = vpop.f32.mrf.mxu0 }
 0xb89   :  { %v1458_v47 = vpop.f32.mrf.mxu0 }
 0xbaf   :  { %v1564_v50 = vpop.permute.xlu2 %1563 }
 0xbc7   :  { %v1541_v39 = vpop.permute.xlu1 %1540 }
 0xbc8   :  { %v1551_v4 = vsel %vm200_vm1, %v1354_v41, %v1541_v39 }
 0xbcf   :  { %v1545_v40 = vpop.permute.xlu1 %1544  ;;  %v1556_v46 = vpop.permute.xlu0 %1555 }
 0xbd0   :  { %v1552_v43 = vsel %vm724_vm2, %v1551_v4, %v1545_v40  ;;  %v1566_v48 = vsel %vm200_vm1, %v1458_v47, %v1556_v46  ;;  %v2015_v47 = vld [vmem:[%s2981_s10 + $0x50] sm:$0xff] }
 0xbd1   :  { %1736 = vmatpush.msrb.mxu2 %v2015_v47 }
 0xbd7   :  { %v1549_v44 = vpop.permute.xlu1 %1548 }
 0xbd8   :  { %v1553_v45 = vsel %vm726_vm3, %v1552_v43, %v1549_v44 }
 0xbd9   :  { %2003 = vmatmul.msk.f32.vlgmr.msra.gmra.mxu0 %vm154_vm0, %v1553_v45 }
 0xbdf   :  { %v1560_v49 = vpop.permute.xlu1 %1559 }
 0xbe0   :  { %v1567_v51 = vsel %vm724_vm2, %v1566_v48, %v1560_v49  ;;  %v2014_v48 = vld [vmem:[%s2981_s10 + $0x48] sm:$0xff]  ;;  %v2013_v49 = vld [vmem:[%s2981_s10 + $0x40] sm:$0xff] }
 0xbe1   :  { %v1568_v52 = vsel %vm726_vm3, %v1567_v51, %v1564_v50  ;;  %1737 = vmatpush.msrb.mxu2 %v2014_v48  ;;  %v2074_v50 = vld [vmem:[%s2980_s9 + $0x1] ss:$0 sm:$0xff] }
 0xbe2   :  { %2004 = vmatmul.msk.f32.gmra.mxu0 %vm154_vm0, %v1568_v52 }
 0xbe3   :  { %1738 = vmatpush.msrb.mxu2 %v2013_v49 }
 0xc56   :  { %v1602_v38 = vpop.f32.mrf.mxu0 }
 0xc57   :  { %v1603_v36 = vadd.f32 %v2073_v53, %v1602_v38 }
 0xc59   :  { %v1610_v54 = vadd.f32 %v1603_v36, %v2719_v26 }
 0xc5b   :  { %v1612_v55 = vsel %vm154_vm0, %v1610_v54, 0.0 }
 0xc5c   :  { %1613 = vadd.xlane.f32.xlu1 %v1612_v55  ;;  %v2075_v55 = vld [vmem:[#allocation11 + $0x1] ss:$0 sm:$0xff] }
 0xc5f   :  { %v1605_v35 = vpop.f32.mrf.mxu0 }
 0xc60   :  { %v1606_v37 = vadd.f32 %v2073_v53, %v1605_v35 }
 0xc62   :  { %v1611_v56 = vadd.f32 %v1606_v37, %v2723_v32  ;;  %v2009_v32 = vld [vmem:[%s2979_s8 + $0x38] sm:$0xff] }
 0xc63   :  { %1690 = vmatpush.msrb.mxu1 %v2009_v32 }
 0xc64   :  { %v1615_v33 = vsel %vm154_vm0, %v1611_v56, 0.0 }
 0xc65   :  { %1616 = vadd.xlane.f32.xlu0 %v1615_v33  ;;  %1691 = vmatpush.msrb.mxu1 %v2008_v0 }
 0xc67   :  { %1692 = vmatpush.msrb.mxu1 %v2007_v1 }
 0xc69   :  { %1693 = vmatpush.msrb.mxu1 %v2006_v2 }
 0xccf   :  { %v1614_v57 = vpop.xlane.xlu1 %1613 }
 0xcd0   :  { %v1618_v11 = vmul.f32 %v1614_v57, %v2642_v42 }
 0xcd2   :  { %v1620_v58 = vsub.f32 %v1610_v54, %v1618_v11 }
 0xcd4   :  { %v1622_v5 = vmul.f32 %v1620_v58, %v1620_v58 }
 0xcd6   :  { %v1624_v59 = vsel %vm154_vm0, %v1622_v5, 0.0 }
 0xcd7   :  { %1625 = vadd.xlane.f32.xlu2 %v1624_v59 }
 0xcd8   :  { %v1617_v60 = vpop.xlane.xlu0 %1616 }
 0xcd9   :  { %v1619_v26 = vmul.f32 %v1617_v60, %v2642_v42 }
 0xcdb   :  { %v1621_v61 = vsub.f32 %v1611_v56, %v1619_v26 }
 0xcdd   :  { %v1623_v62 = vmul.f32 %v1621_v61, %v1621_v61 }
 0xcdf   :  { %v1627_v63 = vsel %vm154_vm0, %v1623_v62, 0.0 }
 0xce0   :  { %1628 = vadd.xlane.f32.xlu1 %v1627_v63 }
 0xd4a   :  { %v1626_v3 = vpop.xlane.xlu2 %1625 }
 0xd4b   :  { %v1630_v6 = vmul.f32 %v1626_v3, %v2642_v42 }
 0xd4d   :  { %v1632_v7 = vadd.f32 1e-05, %v1630_v6 }
 0xd4f   :  { %2152 = vrsqrt.f32 %v1632_v7  ;;  %vm1640_vm2 = vweird.f32 %v1632_v7 }
 0xd53   :  { %v1629_v17 = vpop.xlane.xlu1 %1628 }
 0xd54   :  { %v1631_v18 = vmul.f32 %v1629_v17, %v2642_v42 }
 0xd55   :  { %v2153_v20 = vpop.eup %2152 }
 0xd56   :  { %v1635_v21 = vmul.f32 %v2153_v20, %v1632_v7  ;;  %v1633_v22 = vadd.f32 1e-05, %v1631_v18  ;;  %vm1641_vm1 = vweird.f32 %v2153_v20 }
 0xd57   :  { %vm1642_vm3 = vmor %vm1640_vm2, %vm1641_vm1 }
 0xd58   :  { %v1636_v24 = vmul.f32 %v2153_v20, %v1635_v21  ;;  %2154 = vrsqrt.f32 %v1633_v22  ;;  %vm1650_vm7 = vweird.f32 %v1633_v22 }
 0xd5a   :  { %v1637_v25 = vmul.f32 0.5, %v1636_v24 }
 0xd5c   :  { %v1638_v28 = vsub.f32 1.5, %v1637_v25 }
 0xd5e   :  { %v2155_v29 = vpop.eup %2154  ;;  %v1639_v31 = vmul.f32 %v2153_v20, %v1638_v28 }
 0xd5f   :  { %v1645_v15 = vmul.f32 %v2155_v29, %v1633_v22  ;;  %vm1651_vm6 = vweird.f32 %v2155_v29  ;;  %v2023_v22 = vld [vmem:[%s2983_s12 + $0x2] sm:$0x3] }
 0xd60   :  { %v1643_v34 = vsel %vm1642_vm3, %v2153_v20, %v1639_v31  ;;  %vm1652_vm8 = vmor %vm1650_vm7, %vm1651_vm6  ;;  %v1794_v27 = vperm.slane %v2023_v22, 0  ;;  %vm1874_vm6 = vcmask 7168  }
 0xd61   :  { %v1654_v12 = vmul.f32 %v1643_v34, %v1620_v58  ;;  %v1646_v8 = vmul.f32 %v2155_v29, %v1645_v15 }
 0xd63   :  { %v1657_v30 = vmul.f32 %v1656_v14, %v1654_v12  ;;  %v1647_v39 = vmul.f32 0.5, %v1646_v8 }
 0xd65   :  { %v1648_v40 = vsub.f32 1.5, %v1647_v39  ;;  %v1660_v41 = vadd.f32 %v1659_v10, %v1657_v30 }
 0xd67   :  { %v1649_v4 = vmul.f32 %v2155_v29, %v1648_v40  ;;  %2011 = vmatmul.msk.f32.vlgmr.msrb.gmra.mxu1 %vm154_vm0, %v1660_v41 }
 0xd69   :  { %v1653_v43 = vsel %vm1652_vm8, %v2155_v29, %v1649_v4 }
 0xd6a   :  { %v1655_v44 = vmul.f32 %v1653_v43, %v1621_v61 }
 0xd6c   :  { %v1658_v45 = vmul.f32 %v1656_v14, %v1655_v44  ;;  %v1797_v14 = vperm.slane %v2023_v22, 1  ;;  %v1865_v22 = vld [vmem:[#allocation7 + $0x8] sm:$0xff] }
 0xd6e   :  { %v1661_v46 = vadd.f32 %v1659_v10, %v1658_v45 }
 0xd70   :  { %2012 = vmatmul.msk.f32.gmra.mxu1 %vm154_vm0, %v1661_v46 }
 0xde4   :  { %v1695_v51 = vpop.f32.mrf.mxu1 }
 0xde5   :  { %v1696_v52 = vadd.f32 %v2074_v50, %v1695_v51 }
 0xde7   :  { %v1701_v53 = vmax.f32 %v1696_v52, 0.0 }
 0xde9   :  { %2021 = vmatmul.msk.f32.vlgmr.msrb.gmra.mxu2 %vm891_vm11, %v1701_v53 }
 0xded   :  { %v1698_v38 = vpop.f32.mrf.mxu1 }
 0xdee   :  { %v1699_v36 = vadd.f32 %v2074_v50, %v1698_v38 }
 0xdf0   :  { %v1702_v54 = vmax.f32 %v1699_v36, 0.0 }
 0xdf2   :  { %2022 = vmatmul.msk.f32.gmra.mxu2 %vm891_vm11, %v1702_v54 }
 0xe6c   :  { %v1740_v35 = vpop.f32.mrf.mxu2 }
 0xe6d   :  { %v1741_v37 = vadd.f32 %v2075_v55, %v1740_v35 }
 0xe6f   :  { %v1748_v56 = vadd.f32 %v1741_v37, %v1660_v41 }
 0xe71   :  { %v1750_v33 = vsel %vm154_vm0, %v1748_v56, 0.0 }
 0xe72   :  { %1751 = vadd.xlane.f32.xlu1 %v1750_v33 }
 0xe75   :  { %v1743_v57 = vpop.f32.mrf.mxu2 }
 0xe76   :  { %v1744_v11 = vadd.f32 %v2075_v55, %v1743_v57 }
 0xe78   :  { %v1749_v58 = vadd.f32 %v1744_v11, %v1661_v46 }
 0xe7a   :  { %v1753_v5 = vsel %vm154_vm0, %v1749_v58, 0.0 }
 0xe7b   :  { %1754 = vadd.xlane.f32.xlu0 %v1753_v5 }
 0xee5   :  { %v1752_v59 = vpop.xlane.xlu1 %1751 }
 0xee6   :  { %v1756_v60 = vmul.f32 %v1752_v59, %v2642_v42 }
 0xee8   :  { %v1758_v26 = vsub.f32 %v1748_v56, %v1756_v60 }
 0xeea   :  { %v1760_v61 = vmul.f32 %v1758_v26, %v1758_v26 }
 0xeec   :  { %v1762_v62 = vsel %vm154_vm0, %v1760_v61, 0.0 }
 0xeed   :  { %1763 = vadd.xlane.f32.xlu2 %v1762_v62 }
 0xeee   :  { %v1755_v63 = vpop.xlane.xlu0 %1754 }
 0xeef   :  { %v1757_v32 = vmul.f32 %v1755_v63, %v2642_v42  ;;  %v2077_v63 = vld [vmem:[%s2984_s13 + $0x1] ss:$0 sm:$0xff] }
 0xef1   :  { %v1759_v0 = vsub.f32 %v1749_v58, %v1757_v32 }
 0xef3   :  { %v1761_v1 = vmul.f32 %v1759_v0, %v1759_v0 }
 0xef5   :  { %v1765_v2 = vsel %vm154_vm0, %v1761_v1, 0.0  ;;  %v1864_v1 = vld [vmem:[#allocation7] sm:$0xff] }
 0xef6   :  { %1766 = vadd.xlane.f32.xlu1 %v1765_v2  ;;  %v1854_v2 = vld [vmem:[#allocation5] sm:$0xff] }
 0xf60   :  { %v1764_v3 = vpop.xlane.xlu2 %1763 }
 0xf61   :  { %v1768_v6 = vmul.f32 %v1764_v3, %v2642_v42 }
 0xf63   :  { %v1770_v7 = vadd.f32 1e-05, %v1768_v6 }
 0xf65   :  { %2156 = vrsqrt.f32 %v1770_v7  ;;  %vm1778_vm10 = vweird.f32 %v1770_v7 }
 0xf69   :  { %v1767_v9 = vpop.xlane.xlu1 %1766 }
 0xf6a   :  { %v1769_v13 = vmul.f32 %v1767_v9, %v2642_v42 }
 0xf6b   :  { %v2157_v16 = vpop.eup %2156 }
 0xf6c   :  { %v1773_v17 = vmul.f32 %v2157_v16, %v1770_v7  ;;  %v1771_v18 = vadd.f32 1e-05, %v1769_v13  ;;  %vm1779_vm9 = vweird.f32 %v2157_v16 }
 0xf6d   :  { %vm1780_vm11 = vmor %vm1778_vm10, %vm1779_vm9 }
 0xf6e   :  { %v1774_v19 = vmul.f32 %v2157_v16, %v1773_v17  ;;  %2158 = vrsqrt.f32 %v1771_v18  ;;  %vm1788_vm13 = vweird.f32 %v1771_v18 }
 0xf70   :  { %v1775_v20 = vmul.f32 0.5, %v1774_v19 }
 0xf72   :  { %v1776_v21 = vsub.f32 1.5, %v1775_v20 }
 0xf74   :  { %v2159_v23 = vpop.eup %2158  ;;  %v1777_v24 = vmul.f32 %v2157_v16, %v1776_v21  ;;  %v1855_v21 = vld [vmem:[#allocation5 + $0x8] sm:$0xff] }
 0xf75   :  { %v1783_v25 = vmul.f32 %v2159_v23, %v1771_v18  ;;  %vm1789_vm12 = vweird.f32 %v2159_v23 }
 0xf76   :  { %v1781_v28 = vsel %vm1780_vm11, %v2157_v16, %v1777_v24  ;;  %vm1790_vm14 = vmor %vm1788_vm13, %vm1789_vm12 }
 0xf77   :  { %v1784_v29 = vmul.f32 %v2159_v23, %v1783_v25  ;;  %v1792_v31 = vmul.f32 %v1781_v28, %v1758_v26  ;;  %v2076_v26 = vld [vmem:[%s2984_s13] ss:$0 sm:$0xff]  ;;  %s2359_s13 = smov [#allocation13]  }
 0xf78   :  { %s1915_s11 = sshll.u32 %s2359_s13, 4  ;;  %s1916_s11 = int_to_ptr.vmem [resolvable:$true] %s1915_s11 }
 0xf79   :  { %v1785_v15 = vmul.f32 0.5, %v1784_v29  ;;  %v1795_v34 = vmul.f32 %v1794_v27, %v1792_v31 }
 0xf7b   :  { %v1786_v12 = vsub.f32 1.5, %v1785_v15  ;;  %v1798_v8 = vadd.f32 %v1797_v14, %v1795_v34 }
 0xf7d   :  { %v1787_v10 = vmul.f32 %v2159_v23, %v1786_v12  ;;  %v1802_v30 = vsel %vm154_vm0, %v1798_v8, 0.0 }
 0xf7e   :  { %1803 = vadd.xlane.f32.xlu0 %v1802_v30 }
 0xf7f   :  { %v1791_v39 = vsel %vm1790_vm14, %v2159_v23, %v1787_v10 }
 0xf80   :  { %v1793_v40 = vmul.f32 %v1791_v39, %v1759_v0 }
 0xf82   :  { %v1796_v41 = vmul.f32 %v1794_v27, %v1793_v40 }
 0xf84   :  { %v1799_v4 = vadd.f32 %v1797_v14, %v1796_v41 }
 0xf86   :  { %v1805_v43 = vsel %vm154_vm0, %v1799_v4, 0.0 }
 0xf87   :  { %1806 = vadd.xlane.f32.xlu2 %v1805_v43 }
 0xff1   :  { %v1804_v44 = vpop.xlane.xlu0 %1803 }
 0xff2   :  { %v1808_v45 = vmul.f32 %v1804_v44, %v2642_v42 }
 0xff4   :  { %v1810_v46 = vsub.f32 %v1798_v8, %v1808_v45 }
 0xff6   :  { %v1812_v47 = vmul.f32 %v1810_v46, %v1810_v46 }
 0xff8   :  { %v1814_v48 = vsel %vm154_vm0, %v1812_v47, 0.0 }
 0xff9   :  { %1815 = vadd.xlane.f32.xlu1 %v1814_v48 }
 0xffa   :  { %v1807_v49 = vpop.xlane.xlu2 %1806 }
 0xffb   :  { %v1809_v50 = vmul.f32 %v1807_v49, %v2642_v42 }
 0xffd   :  { %v1811_v51 = vsub.f32 %v1799_v4, %v1809_v50 }
 0xfff   :  { %v1813_v52 = vmul.f32 %v1811_v51, %v1811_v51 }
0x1001   :  { %v1817_v53 = vsel %vm154_vm0, %v1813_v52, 0.0 }
0x1002   :  { %1818 = vadd.xlane.f32.xlu0 %v1817_v53 }
0x106c   :  { %v1816_v38 = vpop.xlane.xlu1 %1815 }
0x106d   :  { %v1820_v36 = vmul.f32 %v1816_v38, %v2642_v42 }
0x106f   :  { %v1822_v54 = vadd.f32 1e-08, %v1820_v36 }
0x1071   :  { %2160 = vrsqrt.f32 %v1822_v54  ;;  %vm1830_vm4 = vweird.f32 %v1822_v54 }
0x1075   :  { %v1819_v55 = vpop.xlane.xlu0 %1818 }
0x1076   :  { %v1821_v35 = vmul.f32 %v1819_v55, %v2642_v42 }
0x1077   :  { %v2161_v37 = vpop.eup %2160 }
0x1078   :  { %v1825_v56 = vmul.f32 %v2161_v37, %v1822_v54  ;;  %v1823_v33 = vadd.f32 1e-08, %v1821_v35  ;;  %vm1831_vm15 = vweird.f32 %v2161_v37 }
0x1079   :  { %vm1832_vm5 = vmor %vm1830_vm4, %vm1831_vm15 }
0x107a   :  { %v1826_v57 = vmul.f32 %v2161_v37, %v1825_v56  ;;  %2162 = vrsqrt.f32 %v1823_v33  ;;  %vm1840_vm2 = vweird.f32 %v1823_v33 }
0x107c   :  { %v1827_v11 = vmul.f32 0.5, %v1826_v57 }
0x107e   :  { %v1828_v58 = vsub.f32 1.5, %v1827_v11 }
0x1080   :  { %v2163_v5 = vpop.eup %2162  ;;  %v1829_v59 = vmul.f32 %v2161_v37, %v1828_v58 }
0x1081   :  { %v1835_v60 = vmul.f32 %v2163_v5, %v1823_v33  ;;  %vm1841_vm1 = vweird.f32 %v2163_v5 }
0x1082   :  { %v1833_v61 = vsel %vm1832_vm5, %v2161_v37, %v1829_v59  ;;  %vm1842_vm3 = vmor %vm1840_vm2, %vm1841_vm1 }
0x1083   :  { %v1844_v62 = vmul.f32 %v1833_v61, %v1810_v46  ;;  %v1836_v42 = vmul.f32 %v2163_v5, %v1835_v60 }
0x1085   :  { %v1837_v32 = vmul.f32 0.5, %v1836_v42  ;;  %v1847_v0 = vmul.f32 %v2076_v26, %v1844_v62 }
0x1087   :  { %v1838_v3 = vsub.f32 1.5, %v1837_v32  ;;  %v1850_v6 = vadd.f32 %v2077_v63, %v1847_v0 }
0x1089   :  { %v1839_v7 = vmul.f32 %v2163_v5, %v1838_v3  ;;  %v1866_v9 = vmul.f32 %v1864_v1, %v1850_v6  ;;  %1852 = vst.msk [vmem:[#allocation13] sm:$0xff] %vm154_vm0, %v1850_v6  ;;  %v1856_v13 = vmul.f32 %v1854_v2, %v1850_v6 }
0x108b   :  { %v1843_v16 = vsel %vm1842_vm3, %v2163_v5, %v1839_v7  ;;  %v1868_v17 = vsel %vm154_vm0, %v1866_v9, 0.0  ;;  %v1858_v18 = vsel %vm154_vm0, %v1856_v13, 0.0 }
0x108c   :  { %v1845_v19 = vmul.f32 %v1843_v16, %v1811_v51  ;;  %1869 = vadd.xlane.f32.xlu1 %v1868_v17  ;;  %1859 = vadd.xlane.f32.xlu2 %v1858_v18 }
0x108e   :  { %v1848_v20 = vmul.f32 %v2076_v26, %v1845_v19 }
0x1090   :  { %v1851_v23 = vadd.f32 %v2077_v63, %v1848_v20 }
0x1092   :  { %v1857_v24 = vmul.f32 %v1855_v21, %v1851_v23  ;;  %1853 = vst.msk [vmem:[#allocation13 + $0x8] sm:$0xff] %vm154_vm0, %v1851_v23  ;;  %v1867_v25 = vmul.f32 %v1865_v22, %v1851_v23 }
0x1093   :  { %1923 = dma.vmem_to_hbm [thread:$0]  %s1916_s11, 256, %s1918_s20, [#allocation4], %s2343_s26, %s2343_s26, %s2344_s27  }
0x1094   :  { %v1861_v27 = vsel %vm154_vm0, %v1857_v24, 0.0  ;;  %v1871_v28 = vsel %vm154_vm0, %v1867_v25, 0.0  ;;  %vm1909_vm0 = vcmask 123904  }
0x1095   :  { %1862 = vadd.xlane.f32.xlu0 %v1861_v27  ;;  %1872 = vadd.xlane.f32.xlu2 %v1871_v28 }
0x10ff   :  { %v1870_v29 = vpop.xlane.xlu1 %1869  ;;  %v1860_v31 = vpop.xlane.xlu2 %1859 }
0x1100   :  { %v1875_v14 = vsel %vm1874_vm6, %v1860_v31, %v1870_v29 }
0x1101   :  { %1877 = vxpose.xlu1.b32.start [1/2] (short) (narrow) %v1875_v14, 8 }
0x1108   :  { %v1863_v15 = vpop.xlane.xlu0 %1862  ;;  %v1873_v34 = vpop.xlane.xlu2 %1872 }
0x1109   :  { %v1876_v12 = vsel %vm1874_vm6, %v1863_v15, %v1873_v34 }
0x110a   :  { %1878 = vxpose.xlu1.b32.end [2/2] (short) (narrow) %v1876_v12, 8 }
0x11a6   :  { %v1893_v8 = vpop.trf.xlu1 }
0x11a7   :  { %1910 = vst.msk [vmem:[%s2986_s15] sm:$0x3] %vm1909_vm0, %v1893_v8 }
0x11a8   :  { %2340 = dma.done.wait [#allocation4], 256  }
0x11a9   :  { %2341 = vsyncadd [#allocation4], 4294967040 }
0x11aa   :  { %1932 = vsyncpa [#allocation3], 1 }
0x11ab   :  { %1933 = vsyncpa [#allocation6], 1 }
0x11ac   :  { %1934 = vsyncpa [#allocation9], 1 }
0x11ad   :  { %1935 = vsyncpa [#allocation12], 1 }
0x11ae   :  { %1936 = vsyncpa [#allocation4], 1 }

</bundles_post_ra>
